<compile_context>
chip_gen: v6e
topology: v6e:2x2x1
jax: 0.10.0
libtpu: 0.0.40
codegen_flags: <defaults>
</compile_context>

<pallas_src>
import functools

import jax
import jax.numpy as jnp
from jax import lax
from jax.experimental import pallas as pl
from jax.experimental.pallas import tpu as pltpu


# ----------------------------- fused Pallas kernel -------------------------- #

def _fused_vcr_kernel(x_ref, g_ref, len_ref, u_ref, lab_ref,
                      wtoe_ref, bconv_ref, wih_ref, whh_ref, bgate_ref,
                      wout_ref, bout_ref, loss_ref, xp_ref,
                      *, tile_r, n_steps, filter_num, l_outs, hidden, mxu_dtype):
    TR, Lv, F, H = tile_r, n_steps, filter_num, hidden
    n_f = len(l_outs)

    # ---- char-CNN: ONE block-Toeplitz MXU push covering every window position
    # of every filter size over all (row, video-step) titles in this tile.
    x = jnp.concatenate([x_ref[v] for v in range(Lv)], axis=0)        # (Lv*TR, Lt*Cc)
    conv = jnp.dot(x.astype(mxu_dtype), wtoe_ref[...].astype(mxu_dtype),
                   preferred_element_type=jnp.float32)                # (Lv*TR, sum(l_out)*F)

    # Max over window positions (VPU, static lane slices) + bias + ReLU.
    feats = []
    off = 0
    for s, l_out in enumerate(l_outs):
        m = conv[:, off:off + F]
        for l in range(1, l_out):
            m = jnp.maximum(m, conv[:, off + l * F:off + (l + 1) * F])
        feats.append(jnp.maximum(m + bconv_ref[:, s * F:(s + 1) * F], 0.0))
        off += l_out * F

    # ---- hoisted LSTM input projection for ALL time steps (off the serial
    # path), staged in VMEM scratch so it never sits in vregs during the loop.
    wih = wih_ref[...]                                                # (Din, 4H), gate order i,f,o,g
    g_in = jnp.concatenate([g_ref[v] for v in range(Lv)], axis=0)     # (Lv*TR, G)
    xp = jnp.dot(g_in.astype(mxu_dtype), wih[n_f * F:, :].astype(mxu_dtype),
                 preferred_element_type=jnp.float32)
    for s, f in enumerate(feats):
        xp = xp + jnp.dot(f.astype(mxu_dtype),
                          wih[s * F:(s + 1) * F, :].astype(mxu_dtype),
                          preferred_element_type=jnp.float32)
    xp_ref[...] = xp + bgate_ref[...]                                 # (Lv*TR, 4H)

    # ---- length-masked recurrence: only h @ W_hh + gate math per step.
    # TODO(synk): for large hidden sizes consider the transposed (4H, R) gate
    # layout so the growing candidate*batch axis fills the 128 lanes.
    whh = whh_ref[...].astype(mxu_dtype)                              # (H, 4H)
    lens = len_ref[...]                                               # (TR, 1) int32

    def step(t, carry):
        h, c = carry
        base = pl.multiple_of(t * TR, TR)
        gates = (xp_ref[pl.ds(base, TR), :]
                 + jnp.dot(h.astype(mxu_dtype), whh,
                           preferred_element_type=jnp.float32))       # (TR, 4H)
        sg = jax.nn.sigmoid(gates[:, 0:3 * H])      # i, f, o -- contiguous 3H EUP block
        gg = jnp.tanh(gates[:, 3 * H:4 * H])        # g       -- H EUP block
        c_new = sg[:, H:2 * H] * c + sg[:, 0:H] * gg
        h_new = sg[:, 2 * H:3 * H] * jnp.tanh(c_new)
        valid = lens > t                            # pack_padded_sequence semantics
        return jnp.where(valid, h_new, h), jnp.where(valid, c_new, c)

    init = (jnp.zeros((TR, H), jnp.float32), jnp.zeros((TR, H), jnp.float32))
    h, _ = lax.fori_loop(0, Lv, step, init, unroll=True)

    # ---- scoring head (VPU/XLU reduce; no degenerate (R,H)@(H,1) MXU push)
    # and per-row BCE-with-logits (mean taken in the wrapper).
    score = (jnp.sum(u_ref[...] * h * wout_ref[...], axis=-1, keepdims=True)
             + bout_ref[0, 0])
    y = lab_ref[...]
    loss_ref[...] = (jnp.maximum(score, 0.0) - score * y
                     + jnp.log(1.0 + jnp.exp(-jnp.abs(score))))


# ----------------------------- weight preparation --------------------------- #

def _build_toeplitz(conv_raw, filter_sizes, Lt, Cc, F):
    """Block-Toeplitz conv weight: (Lt*Cc, sum(l_out)*F), zero outside windows."""
    l_outs = tuple(Lt - k + 1 for k in filter_sizes)
    w_toe = jnp.zeros((Lt * Cc, sum(l_outs) * F), jnp.float32)
    b_all = []
    off = 0
    for (W, b), k, l_out in zip(conv_raw, filter_sizes, l_outs):
        # W: (F, Cc, k) torch Conv1d layout; W_toe[t*Cc+c, off+l*F+j] = W[j,c,t-l]
        for l in range(l_out):
            for dt in range(k):
                blk = jnp.transpose(W[:, :, dt])                       # (Cc, F)
                w_toe = w_toe.at[(l + dt) * Cc:(l + dt + 1) * Cc,
                                 off + l * F:off + (l + 1) * F].set(blk)
        b_all.append(b.reshape(1, F))
        off += l_out * F
    return w_toe, jnp.concatenate(b_all, axis=-1)


def _gate_permute(w, H):
    """Torch LSTM gate column order (i, f, g, o) -> kernel order (i, f, o, g)."""
    return jnp.concatenate(
        [w[..., 0:2 * H], w[..., 3 * H:4 * H], w[..., 2 * H:3 * H]], axis=-1)


def init_params(key, cfg):
    H = cfg['embedding_dim']
    Cc = cfg['char_embedding_dim']
    G = cfg['genre_embedding_dim']
    F = cfg['filter_num']
    sizes = cfg['filter_sizes']
    Lt = cfg['maximum_title_length']
    Din = F * len(sizes) + G
    ks = jax.random.split(key, 8 + 2 * len(sizes))

    def u(k, shape, scale=1.0):
        return jax.random.uniform(k, shape, jnp.float32, -1.0, 1.0) * scale

    p = {}
    p['user_emb'] = u(ks[0], (cfg['user_num'], H))
    p['char_emb'] = u(ks[1], (cfg['char_num'], Cc))
    p['genre_emb'] = u(ks[2], (cfg['genre_num'], G))
    conv_raw = []
    for i, ksz in enumerate(sizes):
        W = u(ks[8 + 2 * i], (F, Cc, ksz), 0.3)          # torch Conv1d (out,in,k)
        b = u(ks[9 + 2 * i], (F,), 0.3)
        conv_raw.append((W, b))
    p['conv_raw'] = conv_raw
    p['conv_w_toe'], p['conv_b_row'] = _build_toeplitz(conv_raw, sizes, Lt, Cc, F)
    p['lstm_wih'] = u(ks[3], (Din, 4 * H), 0.2)          # torch gate order i,f,g,o
    p['lstm_whh'] = u(ks[4], (H, 4 * H), 0.2)
    p['lstm_b'] = u(ks[5], (1, 4 * H), 0.2)
    p['out_w'] = u(ks[6], (1, H), 0.3)                   # Linear(H,1) weight row
    p['out_b'] = u(ks[7], (1, 1), 0.3)
    return p


# ----------------------------- forward (Pallas path) ------------------------ #

def vcr_forward_pallas(p, users, titles, genres, lengths,
                       neg_titles, neg_genres, neg_lengths, labels, cfg,
                       tile_r=8, mxu_dtype=jnp.float32):
    # tile_r: rows of the candidate*batch axis per grid step (multiple of 8).
    # At production sizes pick the largest tile_r that fits VMEM (>= 512 rows);
    # mxu_dtype=jnp.bfloat16 doubles MXU throughput on v6e/v7x (f32 accumulate).
    assert tile_r % 8 == 0
    H = cfg['embedding_dim']
    Cc = cfg['char_embedding_dim']
    G = cfg['genre_embedding_dim']
    F = cfg['filter_num']
    sizes = cfg['filter_sizes']
    Lt = cfg['maximum_title_length']
    l_outs = tuple(Lt - k + 1 for k in sizes)
    assert Lt >= max(sizes)
    B = users.shape[0]

    # --- batch positive + negative candidates along a candidate axis ---------
    all_t = jnp.concatenate([titles[:, None], neg_titles], axis=1)    # (B,C,Lv,Lt)
    all_g = jnp.concatenate([genres[:, None], neg_genres], axis=1)    # (B,C,Lv)
    all_l = jnp.concatenate([lengths[:, None], neg_lengths], axis=1)  # (B,C)
    Cn, Lv = all_t.shape[1], all_t.shape[2]
    tT = jnp.swapaxes(all_t, 0, 1)                                    # (C,B,Lv,Lt)
    gT = jnp.swapaxes(all_g, 0, 1)
    lT = jnp.swapaxes(all_l, 0, 1)

    # Per-candidate descending-length permutation (as in the PyTorch module).
    perm = jnp.argsort(-lT, axis=1)                                   # (C,B)
    tS = jnp.take_along_axis(tT, perm[:, :, None, None], axis=1)
    gS = jnp.take_along_axis(gT, perm[:, :, None], axis=1)
    lS = jnp.take_along_axis(lT, perm, axis=1)
    uS = jnp.take(p['user_emb'], users, axis=0)[perm]                 # (C,B,H)

    R = Cn * B
    TR = tile_r
    R_pad = ((R + TR - 1) // TR) * TR

    # Time-major int32 index arrays -> the f32 embedding gathers land directly
    # in the kernel layout (no f32 transpose pass in HBM).
    # TODO(synk): move these gathers into the kernel (DMA / one-hot gather) so
    # the (Lv,R,Lt*Cc) f32 intermediate disappears at production scale.
    t_idx = jnp.transpose(tS, (2, 0, 1, 3)).reshape(Lv, R, Lt)
    g_idx = jnp.transpose(gS, (2, 0, 1)).reshape(Lv, R)
    x_emb = jnp.take(p['char_emb'], t_idx, axis=0).reshape(Lv, R, Lt * Cc)
    g_emb = jnp.take(p['genre_emb'], g_idx, axis=0)                   # (Lv,R,G)
    lens_rows = lS.reshape(R, 1).astype(jnp.int32)
    u_rows = uS.reshape(R, H)
    # logits[b,c] pairs with labels[b,c]; labels are constant within a candidate
    # so the per-candidate length permutation does not change the loss.
    labels_rows = jnp.swapaxes(labels, 0, 1).reshape(R, 1).astype(jnp.float32)

    pad = R_pad - R
    if pad:
        x_emb = jnp.pad(x_emb, ((0, 0), (0, pad), (0, 0)))
        g_emb = jnp.pad(g_emb, ((0, 0), (0, pad), (0, 0)))
        lens_rows = jnp.pad(lens_rows, ((0, pad), (0, 0)))            # len 0 -> frozen state
        u_rows = jnp.pad(u_rows, ((0, pad), (0, 0)))
        labels_rows = jnp.pad(labels_rows, ((0, pad), (0, 0)))

    # Kernel gate order (i,f,o,g): sigmoid over ONE contiguous 3H block.
    wih = _gate_permute(p['lstm_wih'], H)
    whh = _gate_permute(p['lstm_whh'], H)
    bg = _gate_permute(p['lstm_b'], H)

    Ltc = Lt * Cc
    Ctot = sum(l_outs) * F
    Din = F * len(sizes) + G
    grid = (R_pad // TR,)

    kernel = functools.partial(
        _fused_vcr_kernel, tile_r=TR, n_steps=Lv, filter_num=F,
        l_outs=l_outs, hidden=H, mxu_dtype=mxu_dtype)

    losses = pl.pallas_call(
        kernel,
        out_shape=jax.ShapeDtypeStruct((R_pad, 1), jnp.float32),
        grid=grid,
        in_specs=[
            pl.BlockSpec((Lv, TR, Ltc), lambda i: (0, i, 0)),    # char embeddings (time-major)
            pl.BlockSpec((Lv, TR, G), lambda i: (0, i, 0)),      # genre embeddings
            pl.BlockSpec((TR, 1), lambda i: (i, 0)),             # valid lengths
            pl.BlockSpec((TR, H), lambda i: (i, 0)),             # user embeddings (permuted)
            pl.BlockSpec((TR, 1), lambda i: (i, 0)),             # labels
            pl.BlockSpec((Ltc, Ctot), lambda i: (0, 0)),         # block-Toeplitz conv weight
            pl.BlockSpec((1, F * len(sizes)), lambda i: (0, 0)), # conv bias
            pl.BlockSpec((Din, 4 * H), lambda i: (0, 0)),        # W_ih (i,f,o,g)
            pl.BlockSpec((H, 4 * H), lambda i: (0, 0)),          # W_hh (i,f,o,g)
            pl.BlockSpec((1, 4 * H), lambda i: (0, 0)),          # gate bias
            pl.BlockSpec((1, H), lambda i: (0, 0)),              # output weight row
            pl.BlockSpec(memory_space=pltpu.MemorySpace.SMEM),   # output bias scalar
        ],
        out_specs=pl.BlockSpec((TR, 1), lambda i: (i, 0)),
        scratch_shapes=[pltpu.VMEM((Lv * TR, 4 * H), jnp.float32)],   # staged x@W_ih
        compiler_params=pltpu.CompilerParams(
            dimension_semantics=("parallel",),        # independent row tiles -> both TCs on v7x
            vmem_limit_bytes=32 * 1024 * 1024),
    )(x_emb, g_emb, lens_rows, u_rows, labels_rows,
      p['conv_w_toe'], p['conv_b_row'], wih, whh, bg, p['out_w'], p['out_b'])

    return jnp.sum(losses[:R, 0]) / R


# ----------------------------- pure-JAX reference --------------------------- #

def vcr_forward_ref(p, users, titles, genres, lengths,
                    neg_titles, neg_genres, neg_lengths, labels, cfg):
    H = cfg['embedding_dim']

    def char_cnn(t2d):                                   # (N, Lt) int32
        emb = p['char_emb'][t2d]                         # (N, Lt, Cc)
        feats = []
        for (W, b), k in zip(p['conv_raw'], cfg['filter_sizes']):
            L_out = emb.shape[1] - k + 1
            y = sum(jnp.einsum('nlc,jc->nlj', emb[:, dt:dt + L_out, :], W[:, :, dt])
                    for dt in range(k))                  # (N, L_out, F)
            feats.append(jnp.maximum(jnp.max(y, axis=1) + b, 0.0))
        return jnp.concatenate(feats, axis=-1)

    def lstm(x, lens):
        Bn, T, _ = x.shape
        h = jnp.zeros((Bn, H), jnp.float32)
        c = jnp.zeros((Bn, H), jnp.float32)
        for t in range(T):
            gates = x[:, t, :] @ p['lstm_wih'] + h @ p['lstm_whh'] + p['lstm_b']
            i_g = jax.nn.sigmoid(gates[:, 0:H])
            f_g = jax.nn.sigmoid(gates[:, H:2 * H])
            g_g = jnp.tanh(gates[:, 2 * H:3 * H])
            o_g = jax.nn.sigmoid(gates[:, 3 * H:4 * H])
            c_new = f_g * c + i_g * g_g
            h_new = o_g * jnp.tanh(c_new)
            valid = lens > t
            c = jnp.where(valid, c_new, c)
            h = jnp.where(valid, h_new, h)
        return h

    def get_score(us, ts, gs, ls):
        uu = p['user_emb'][us]
        Bn, Lv, Lt = ts.shape
        feat = char_cnn(ts.reshape(Bn * Lv, Lt)).reshape(Bn, Lv, -1)
        g_emb = p['genre_emb'][gs]
        perm = jnp.argsort(-ls)
        x = jnp.concatenate([feat[perm], g_emb[perm]], axis=2)
        h = lstm(x, ls[perm][:, None])
        return jnp.sum(uu[perm] * h * p['out_w'], axis=-1, keepdims=True) + p['out_b']

    pos = get_score(users, titles, genres, lengths)                   # (B,1)
    negs = [get_score(users, neg_titles[:, i], neg_genres[:, i],
                      neg_lengths[:, i])[:, 0]
            for i in range(neg_titles.shape[1])]
    logits = jnp.concatenate([pos, jnp.stack(negs, axis=1)], axis=1)
    x, y = logits, labels
    return jnp.mean(jnp.maximum(x, 0.0) - x * y + jnp.log(1.0 + jnp.exp(-jnp.abs(x))))


# ----------------------------- main ------------------------------------------ #

if __name__ == "__main__":
    cfg = dict(embedding_dim=16, char_embedding_dim=8, genre_embedding_dim=8,
               user_num=10, item_num=20, char_num=30, genre_num=6,
               filter_num=8, filter_sizes=(2, 3), candidate_num=3,
               maximum_video_length=4, maximum_title_length=12)
    B = 4
    Lv, Lt = cfg['maximum_video_length'], cfg['maximum_title_length']
    num_neg = cfg['candidate_num']

    key = jax.random.PRNGKey(0)
    k = jax.random.split(key, 8)
    users = jax.random.randint(k[0], (B,), 0, cfg['user_num'], jnp.int32)
    titles = jax.random.randint(k[1], (B, Lv, Lt), 0, cfg['char_num'], jnp.int32)
    genres = jax.random.randint(k[2], (B, Lv), 0, cfg['genre_num'], jnp.int32)
    lengths = jax.random.randint(k[3], (B,), 1, Lv + 1, jnp.int32)
    neg_titles = jax.random.randint(k[4], (B, num_neg, Lv, Lt), 0, cfg['char_num'], jnp.int32)
    neg_genres = jax.random.randint(k[5], (B, num_neg, Lv), 0, cfg['genre_num'], jnp.int32)
    neg_lengths = jax.random.randint(k[6], (B, num_neg), 1, Lv + 1, jnp.int32)
    labels = jnp.concatenate([jnp.ones((B, 1), jnp.float32),
                              jnp.zeros((B, num_neg), jnp.float32)], axis=1)

    params = init_params(jax.random.PRNGKey(42), cfg)

    # mxu_dtype=jnp.bfloat16 on v6e/v7x in production; f32 here for a tight check.
    fwd = jax.jit(functools.partial(vcr_forward_pallas, cfg=cfg,
                                    tile_r=8, mxu_dtype=jnp.float32))
    loss = fwd(params, users, titles, genres, lengths,
               neg_titles, neg_genres, neg_lengths, labels)
    jax.block_until_ready(loss)

    loss_ref = vcr_forward_ref(params, users, titles, genres, lengths,
                               neg_titles, neg_genres, neg_lengths, labels, cfg)
    assert jnp.allclose(loss, loss_ref, atol=2e-3, rtol=2e-3), (loss, loss_ref)

    print("KERNEL_OK")
</pallas_src>

<mosaic_0001>
module attributes {stable_mosaic.version = 11 : i64} {
  func.func @_fused_vcr_kernel(%arg0: i32, %arg1: memref<4x8x96xf32, #tpu.memory_space<vmem>>, %arg2: memref<4x8x8xf32, #tpu.memory_space<vmem>>, %arg3: memref<8x1xi32, #tpu.memory_space<vmem>>, %arg4: memref<8x16xf32, #tpu.memory_space<vmem>>, %arg5: memref<8x1xf32, #tpu.memory_space<vmem>>, %arg6: memref<96x168xf32, #tpu.memory_space<vmem>>, %arg7: memref<1x16xf32, #tpu.memory_space<vmem>>, %arg8: memref<24x64xf32, #tpu.memory_space<vmem>>, %arg9: memref<16x64xf32, #tpu.memory_space<vmem>>, %arg10: memref<1x64xf32, #tpu.memory_space<vmem>>, %arg11: memref<1x16xf32, #tpu.memory_space<vmem>>, %arg12: memref<1x1xf32, #tpu.memory_space<smem>>, %arg13: memref<8x1xf32, #tpu.memory_space<vmem>>, %arg14: memref<32x64xf32, #tpu.memory_space<vmem>>) attributes {dimension_semantics = [#tpu.dimension_semantics<parallel>], iteration_bounds = array<i64: 2>, scalar_prefetch = 0 : i64, scratch_operands = 1 : i64, tpu.core_type = #tpu.core_type<tc>, window_params = [{transform_indices = @transform_0, window_bounds = array<i64: 4, 8, 96>}, {transform_indices = @transform_1, window_bounds = array<i64: 4, 8, 8>}, {transform_indices = @transform_2, window_bounds = array<i64: 8, 1>}, {transform_indices = @transform_3, window_bounds = array<i64: 8, 16>}, {transform_indices = @transform_4, window_bounds = array<i64: 8, 1>}, {pipeline_mode = #tpu.pipeline_mode<synchronous>, transform_indices = @transform_5, window_bounds = array<i64: 96, 168>}, {pipeline_mode = #tpu.pipeline_mode<synchronous>, transform_indices = @transform_6, window_bounds = array<i64: 1, 16>}, {pipeline_mode = #tpu.pipeline_mode<synchronous>, transform_indices = @transform_7, window_bounds = array<i64: 24, 64>}, {pipeline_mode = #tpu.pipeline_mode<synchronous>, transform_indices = @transform_8, window_bounds = array<i64: 16, 64>}, {pipeline_mode = #tpu.pipeline_mode<synchronous>, transform_indices = @transform_9, window_bounds = array<i64: 1, 64>}, {pipeline_mode = #tpu.pipeline_mode<synchronous>, transform_indices = @transform_10, window_bounds = array<i64: 1, 16>}, {transform_indices = @transform_11, window_bounds = array<i64: 1, 1>}, {transform_indices = @transform_12, window_bounds = array<i64: 8, 1>}]} {
    %c0 = arith.constant 0 : index
    %c0_0 = arith.constant 0 : index
    %c0_1 = arith.constant 0 : index
    %0 = vector.load %arg1[%c0, %c0_0, %c0_1] : memref<4x8x96xf32, #tpu.memory_space<vmem>>, vector<1x8x96xf32>
    %1 = vector.shape_cast %0 : vector<1x8x96xf32> to vector<8x96xf32>
    %c1 = arith.constant 1 : index
    %c0_2 = arith.constant 0 : index
    %c0_3 = arith.constant 0 : index
    %2 = vector.load %arg1[%c1, %c0_2, %c0_3] : memref<4x8x96xf32, #tpu.memory_space<vmem>>, vector<1x8x96xf32>
    %3 = vector.shape_cast %2 : vector<1x8x96xf32> to vector<8x96xf32>
    %c2 = arith.constant 2 : index
    %c0_4 = arith.constant 0 : index
    %c0_5 = arith.constant 0 : index
    %4 = vector.load %arg1[%c2, %c0_4, %c0_5] : memref<4x8x96xf32, #tpu.memory_space<vmem>>, vector<1x8x96xf32>
    %5 = vector.shape_cast %4 : vector<1x8x96xf32> to vector<8x96xf32>
    %c3 = arith.constant 3 : index
    %c0_6 = arith.constant 0 : index
    %c0_7 = arith.constant 0 : index
    %6 = vector.load %arg1[%c3, %c0_6, %c0_7] : memref<4x8x96xf32, #tpu.memory_space<vmem>>, vector<1x8x96xf32>
    %7 = vector.shape_cast %6 : vector<1x8x96xf32> to vector<8x96xf32>
    %8 = tpu.concatenate %1, %3, %5, %7 in 0 : vector<8x96xf32>, vector<8x96xf32>, vector<8x96xf32>, vector<8x96xf32> -> vector<32x96xf32>
    %c0_8 = arith.constant 0 : index
    %c0_9 = arith.constant 0 : index
    %9 = vector.load %arg6[%c0_8, %c0_9] : memref<96x168xf32, #tpu.memory_space<vmem>>, vector<96x168xf32>
    %cst = arith.constant dense<0.000000e+00> : vector<32x168xf32>
    %10 = tpu.matmul %8, %9, %cst {dimension_numbers = #tpu.dot_dimension_numbers<[1], [0], [0], [1], [0, 0, 1, 1], [], []>} : vector<32x96xf32>, vector<96x168xf32>, vector<32x168xf32> -> vector<32x168xf32>
    %11 = vector.extract_strided_slice %10 {offsets = [0, 0], sizes = [32, 8], strides = [1, 1]} : vector<32x168xf32> to vector<32x8xf32>
    %12 = vector.extract_strided_slice %10 {offsets = [0, 8], sizes = [32, 8], strides = [1, 1]} : vector<32x168xf32> to vector<32x8xf32>
    %13 = arith.maximumf %11, %12 : vector<32x8xf32>
    %14 = vector.extract_strided_slice %10 {offsets = [0, 16], sizes = [32, 8], strides = [1, 1]} : vector<32x168xf32> to vector<32x8xf32>
    %15 = arith.maximumf %13, %14 : vector<32x8xf32>
    %16 = vector.extract_strided_slice %10 {offsets = [0, 24], sizes = [32, 8], strides = [1, 1]} : vector<32x168xf32> to vector<32x8xf32>
    %17 = arith.maximumf %15, %16 : vector<32x8xf32>
    %18 = vector.extract_strided_slice %10 {offsets = [0, 32], sizes = [32, 8], strides = [1, 1]} : vector<32x168xf32> to vector<32x8xf32>
    %19 = arith.maximumf %17, %18 : vector<32x8xf32>
    %20 = vector.extract_strided_slice %10 {offsets = [0, 40], sizes = [32, 8], strides = [1, 1]} : vector<32x168xf32> to vector<32x8xf32>
    %21 = arith.maximumf %19, %20 : vector<32x8xf32>
    %22 = vector.extract_strided_slice %10 {offsets = [0, 48], sizes = [32, 8], strides = [1, 1]} : vector<32x168xf32> to vector<32x8xf32>
    %23 = arith.maximumf %21, %22 : vector<32x8xf32>
    %24 = vector.extract_strided_slice %10 {offsets = [0, 56], sizes = [32, 8], strides = [1, 1]} : vector<32x168xf32> to vector<32x8xf32>
    %25 = arith.maximumf %23, %24 : vector<32x8xf32>
    %26 = vector.extract_strided_slice %10 {offsets = [0, 64], sizes = [32, 8], strides = [1, 1]} : vector<32x168xf32> to vector<32x8xf32>
    %27 = arith.maximumf %25, %26 : vector<32x8xf32>
    %28 = vector.extract_strided_slice %10 {offsets = [0, 72], sizes = [32, 8], strides = [1, 1]} : vector<32x168xf32> to vector<32x8xf32>
    %29 = arith.maximumf %27, %28 : vector<32x8xf32>
    %30 = vector.extract_strided_slice %10 {offsets = [0, 80], sizes = [32, 8], strides = [1, 1]} : vector<32x168xf32> to vector<32x8xf32>
    %31 = arith.maximumf %29, %30 : vector<32x8xf32>
    %c0_10 = arith.constant 0 : index
    %c0_11 = arith.constant 0 : index
    %32 = vector.load %arg7[%c0_10, %c0_11] : memref<1x16xf32, #tpu.memory_space<vmem>>, vector<1x8xf32>
    %33 = vector.broadcast %32 : vector<1x8xf32> to vector<32x8xf32>
    %34 = arith.addf %31, %33 : vector<32x8xf32>
    %cst_12 = arith.constant 0.000000e+00 : f32
    %35 = vector.broadcast %cst_12 : f32 to vector<32x8xf32>
    %36 = arith.maximumf %34, %35 : vector<32x8xf32>
    %37 = vector.extract_strided_slice %10 {offsets = [0, 88], sizes = [32, 8], strides = [1, 1]} : vector<32x168xf32> to vector<32x8xf32>
    %38 = vector.extract_strided_slice %10 {offsets = [0, 96], sizes = [32, 8], strides = [1, 1]} : vector<32x168xf32> to vector<32x8xf32>
    %39 = arith.maximumf %37, %38 : vector<32x8xf32>
    %40 = vector.extract_strided_slice %10 {offsets = [0, 104], sizes = [32, 8], strides = [1, 1]} : vector<32x168xf32> to vector<32x8xf32>
    %41 = arith.maximumf %39, %40 : vector<32x8xf32>
    %42 = vector.extract_strided_slice %10 {offsets = [0, 112], sizes = [32, 8], strides = [1, 1]} : vector<32x168xf32> to vector<32x8xf32>
    %43 = arith.maximumf %41, %42 : vector<32x8xf32>
    %44 = vector.extract_strided_slice %10 {offsets = [0, 120], sizes = [32, 8], strides = [1, 1]} : vector<32x168xf32> to vector<32x8xf32>
    %45 = arith.maximumf %43, %44 : vector<32x8xf32>
    %46 = vector.extract_strided_slice %10 {offsets = [0, 128], sizes = [32, 8], strides = [1, 1]} : vector<32x168xf32> to vector<32x8xf32>
    %47 = arith.maximumf %45, %46 : vector<32x8xf32>
    %48 = vector.extract_strided_slice %10 {offsets = [0, 136], sizes = [32, 8], strides = [1, 1]} : vector<32x168xf32> to vector<32x8xf32>
    %49 = arith.maximumf %47, %48 : vector<32x8xf32>
    %50 = vector.extract_strided_slice %10 {offsets = [0, 144], sizes = [32, 8], strides = [1, 1]} : vector<32x168xf32> to vector<32x8xf32>
    %51 = arith.maximumf %49, %50 : vector<32x8xf32>
    %52 = vector.extract_strided_slice %10 {offsets = [0, 152], sizes = [32, 8], strides = [1, 1]} : vector<32x168xf32> to vector<32x8xf32>
    %53 = arith.maximumf %51, %52 : vector<32x8xf32>
    %54 = vector.extract_strided_slice %10 {offsets = [0, 160], sizes = [32, 8], strides = [1, 1]} : vector<32x168xf32> to vector<32x8xf32>
    %55 = arith.maximumf %53, %54 : vector<32x8xf32>
    %c0_13 = arith.constant 0 : index
    %c8 = arith.constant 8 : index
    %56 = vector.load %arg7[%c0_13, %c8] : memref<1x16xf32, #tpu.memory_space<vmem>>, vector<1x8xf32>
    %57 = vector.broadcast %56 : vector<1x8xf32> to vector<32x8xf32>
    %58 = arith.addf %55, %57 : vector<32x8xf32>
    %cst_14 = arith.constant 0.000000e+00 : f32
    %59 = vector.broadcast %cst_14 : f32 to vector<32x8xf32>
    %60 = arith.maximumf %58, %59 : vector<32x8xf32>
    %c0_15 = arith.constant 0 : index
    %c0_16 = arith.constant 0 : index
    %61 = vector.load %arg8[%c0_15, %c0_16] : memref<24x64xf32, #tpu.memory_space<vmem>>, vector<24x64xf32>
    %c0_17 = arith.constant 0 : index
    %c0_18 = arith.constant 0 : index
    %c0_19 = arith.constant 0 : index
    %62 = vector.load %arg2[%c0_17, %c0_18, %c0_19] : memref<4x8x8xf32, #tpu.memory_space<vmem>>, vector<1x8x8xf32>
    %63 = vector.shape_cast %62 : vector<1x8x8xf32> to vector<8x8xf32>
    %c1_20 = arith.constant 1 : index
    %c0_21 = arith.constant 0 : index
    %c0_22 = arith.constant 0 : index
    %64 = vector.load %arg2[%c1_20, %c0_21, %c0_22] : memref<4x8x8xf32, #tpu.memory_space<vmem>>, vector<1x8x8xf32>
    %65 = vector.shape_cast %64 : vector<1x8x8xf32> to vector<8x8xf32>
    %c2_23 = arith.constant 2 : index
    %c0_24 = arith.constant 0 : index
    %c0_25 = arith.constant 0 : index
    %66 = vector.load %arg2[%c2_23, %c0_24, %c0_25] : memref<4x8x8xf32, #tpu.memory_space<vmem>>, vector<1x8x8xf32>
    %67 = vector.shape_cast %66 : vector<1x8x8xf32> to vector<8x8xf32>
    %c3_26 = arith.constant 3 : index
    %c0_27 = arith.constant 0 : index
    %c0_28 = arith.constant 0 : index
    %68 = vector.load %arg2[%c3_26, %c0_27, %c0_28] : memref<4x8x8xf32, #tpu.memory_space<vmem>>, vector<1x8x8xf32>
    %69 = vector.shape_cast %68 : vector<1x8x8xf32> to vector<8x8xf32>
    %70 = tpu.concatenate %63, %65, %67, %69 in 0 : vector<8x8xf32>, vector<8x8xf32>, vector<8x8xf32>, vector<8x8xf32> -> vector<32x8xf32>
    %71 = vector.extract_strided_slice %61 {offsets = [16, 0], sizes = [8, 64], strides = [1, 1]} : vector<24x64xf32> to vector<8x64xf32>
    %cst_29 = arith.constant dense<0.000000e+00> : vector<32x64xf32>
    %72 = tpu.matmul %70, %71, %cst_29 {dimension_numbers = #tpu.dot_dimension_numbers<[1], [0], [0], [1], [0, 0, 1, 1], [], []>} : vector<32x8xf32>, vector<8x64xf32>, vector<32x64xf32> -> vector<32x64xf32>
    %73 = vector.extract_strided_slice %61 {offsets = [0, 0], sizes = [8, 64], strides = [1, 1]} : vector<24x64xf32> to vector<8x64xf32>
    %cst_30 = arith.constant dense<0.000000e+00> : vector<32x64xf32>
    %74 = tpu.matmul %36, %73, %cst_30 {dimension_numbers = #tpu.dot_dimension_numbers<[1], [0], [0], [1], [0, 0, 1, 1], [], []>} : vector<32x8xf32>, vector<8x64xf32>, vector<32x64xf32> -> vector<32x64xf32>
    %75 = arith.addf %72, %74 : vector<32x64xf32>
    %76 = vector.extract_strided_slice %61 {offsets = [8, 0], sizes = [8, 64], strides = [1, 1]} : vector<24x64xf32> to vector<8x64xf32>
    %cst_31 = arith.constant dense<0.000000e+00> : vector<32x64xf32>
    %77 = tpu.matmul %60, %76, %cst_31 {dimension_numbers = #tpu.dot_dimension_numbers<[1], [0], [0], [1], [0, 0, 1, 1], [], []>} : vector<32x8xf32>, vector<8x64xf32>, vector<32x64xf32> -> vector<32x64xf32>
    %78 = arith.addf %75, %77 : vector<32x64xf32>
    %c0_32 = arith.constant 0 : index
    %c0_33 = arith.constant 0 : index
    %79 = vector.load %arg10[%c0_32, %c0_33] : memref<1x64xf32, #tpu.memory_space<vmem>>, vector<1x64xf32>
    %80 = vector.broadcast %79 : vector<1x64xf32> to vector<32x64xf32>
    %81 = arith.addf %78, %80 : vector<32x64xf32>
    %c0_34 = arith.constant 0 : index
    %c0_35 = arith.constant 0 : index
    %82 = vector.load %arg14[%c0_34, %c0_35] : memref<32x64xf32, #tpu.memory_space<vmem>>, vector<32x64xf32>
    tpu.vector_store %arg14[%c0_34, %c0_35], %81 {strides = array<i32>} : memref<32x64xf32, #tpu.memory_space<vmem>>, vector<32x64xf32>,
    %c0_36 = arith.constant 0 : index
    %c0_37 = arith.constant 0 : index
    %83 = vector.load %arg9[%c0_36, %c0_37] : memref<16x64xf32, #tpu.memory_space<vmem>>, vector<16x64xf32>
    %c0_38 = arith.constant 0 : index
    %c0_39 = arith.constant 0 : index
    %84 = vector.load %arg3[%c0_38, %c0_39] : memref<8x1xi32, #tpu.memory_space<vmem>>, vector<8x1xi32>
    %cst_40 = arith.constant 0.000000e+00 : f32
    %85 = vector.broadcast %cst_40 : f32 to vector<8x16xf32>
    %cst_41 = arith.constant 0.000000e+00 : f32
    %86 = vector.broadcast %cst_41 : f32 to vector<8x16xf32>
    %c0_i32 = arith.constant 0 : i32
    %c8_i32 = arith.constant 8 : i32
    %87 = arith.muli %c0_i32, %c8_i32 : i32
    %88 = tpu.assume_multiple %87, 8 : i32
    %89 = arith.index_cast %88 : i32 to index
    %c0_42 = arith.constant 0 : index
    %90 = vector.load %arg14[%89, %c0_42] : memref<32x64xf32, #tpu.memory_space<vmem>>, vector<8x64xf32>
    %cst_43 = arith.constant dense<0.000000e+00> : vector<8x64xf32>
    %91 = tpu.matmul %85, %83, %cst_43 {dimension_numbers = #tpu.dot_dimension_numbers<[1], [0], [0], [1], [0, 0, 1, 1], [], []>} : vector<8x16xf32>, vector<16x64xf32>, vector<8x64xf32> -> vector<8x64xf32>
    %92 = arith.addf %90, %91 : vector<8x64xf32>
    %93 = vector.extract_strided_slice %92 {offsets = [0, 0], sizes = [8, 48], strides = [1, 1]} : vector<8x64xf32> to vector<8x48xf32>
    %94 = arith.negf %93 : vector<8x48xf32>
    %95 = math.exp %94 : vector<8x48xf32>
    %cst_44 = arith.constant 1.000000e+00 : f32
    %96 = vector.broadcast %cst_44 : f32 to vector<8x48xf32>
    %97 = arith.addf %96, %95 : vector<8x48xf32>
    %98 = arith.divf %96, %97 : vector<8x48xf32>
    %99 = vector.extract_strided_slice %92 {offsets = [0, 48], sizes = [8, 16], strides = [1, 1]} : vector<8x64xf32> to vector<8x16xf32>
    %100 = math.tanh %99 : vector<8x16xf32>
    %101 = vector.extract_strided_slice %98 {offsets = [0, 16], sizes = [8, 16], strides = [1, 1]} : vector<8x48xf32> to vector<8x16xf32>
    %102 = arith.mulf %101, %86 : vector<8x16xf32>
    %103 = vector.extract_strided_slice %98 {offsets = [0, 0], sizes = [8, 16], strides = [1, 1]} : vector<8x48xf32> to vector<8x16xf32>
    %104 = arith.mulf %103, %100 : vector<8x16xf32>
    %105 = arith.addf %102, %104 : vector<8x16xf32>
    %106 = vector.extract_strided_slice %98 {offsets = [0, 32], sizes = [8, 16], strides = [1, 1]} : vector<8x48xf32> to vector<8x16xf32>
    %107 = math.tanh %105 : vector<8x16xf32>
    %108 = arith.mulf %106, %107 : vector<8x16xf32>
    %109 = vector.broadcast %c0_i32 : i32 to vector<8x1xi32>
    %110 = arith.cmpi sgt, %84, %109 : vector<8x1xi32>
    %111 = vector.shape_cast %110 : vector<8x1xi1> to vector<8x1xi1>
    %112 = vector.broadcast %111 : vector<8x1xi1> to vector<8x16xi1>
    %113 = arith.select %112, %108, %85 : vector<8x16xi1>, vector<8x16xf32>
    %114 = vector.shape_cast %110 : vector<8x1xi1> to vector<8x1xi1>
    %115 = vector.broadcast %114 : vector<8x1xi1> to vector<8x16xi1>
    %116 = arith.select %115, %105, %86 : vector<8x16xi1>, vector<8x16xf32>
    %c1_i32 = arith.constant 1 : i32
    %c8_i32_45 = arith.constant 8 : i32
    %117 = arith.muli %c1_i32, %c8_i32_45 : i32
    %118 = tpu.assume_multiple %117, 8 : i32
    %119 = arith.index_cast %118 : i32 to index
    %c0_46 = arith.constant 0 : index
    %120 = vector.load %arg14[%119, %c0_46] : memref<32x64xf32, #tpu.memory_space<vmem>>, vector<8x64xf32>
    %cst_47 = arith.constant dense<0.000000e+00> : vector<8x64xf32>
    %121 = tpu.matmul %113, %83, %cst_47 {dimension_numbers = #tpu.dot_dimension_numbers<[1], [0], [0], [1], [0, 0, 1, 1], [], []>} : vector<8x16xf32>, vector<16x64xf32>, vector<8x64xf32> -> vector<8x64xf32>
    %122 = arith.addf %120, %121 : vector<8x64xf32>
    %123 = vector.extract_strided_slice %122 {offsets = [0, 0], sizes = [8, 48], strides = [1, 1]} : vector<8x64xf32> to vector<8x48xf32>
    %124 = arith.negf %123 : vector<8x48xf32>
    %125 = math.exp %124 : vector<8x48xf32>
    %cst_48 = arith.constant 1.000000e+00 : f32
    %126 = vector.broadcast %cst_48 : f32 to vector<8x48xf32>
    %127 = arith.addf %126, %125 : vector<8x48xf32>
    %128 = arith.divf %126, %127 : vector<8x48xf32>
    %129 = vector.extract_strided_slice %122 {offsets = [0, 48], sizes = [8, 16], strides = [1, 1]} : vector<8x64xf32> to vector<8x16xf32>
    %130 = math.tanh %129 : vector<8x16xf32>
    %131 = vector.extract_strided_slice %128 {offsets = [0, 16], sizes = [8, 16], strides = [1, 1]} : vector<8x48xf32> to vector<8x16xf32>
    %132 = arith.mulf %131, %116 : vector<8x16xf32>
    %133 = vector.extract_strided_slice %128 {offsets = [0, 0], sizes = [8, 16], strides = [1, 1]} : vector<8x48xf32> to vector<8x16xf32>
    %134 = arith.mulf %133, %130 : vector<8x16xf32>
    %135 = arith.addf %132, %134 : vector<8x16xf32>
    %136 = vector.extract_strided_slice %128 {offsets = [0, 32], sizes = [8, 16], strides = [1, 1]} : vector<8x48xf32> to vector<8x16xf32>
    %137 = math.tanh %135 : vector<8x16xf32>
    %138 = arith.mulf %136, %137 : vector<8x16xf32>
    %139 = vector.broadcast %c1_i32 : i32 to vector<8x1xi32>
    %140 = arith.cmpi sgt, %84, %139 : vector<8x1xi32>
    %141 = vector.shape_cast %140 : vector<8x1xi1> to vector<8x1xi1>
    %142 = vector.broadcast %141 : vector<8x1xi1> to vector<8x16xi1>
    %143 = arith.select %142, %138, %113 : vector<8x16xi1>, vector<8x16xf32>
    %144 = vector.shape_cast %140 : vector<8x1xi1> to vector<8x1xi1>
    %145 = vector.broadcast %144 : vector<8x1xi1> to vector<8x16xi1>
    %146 = arith.select %145, %135, %116 : vector<8x16xi1>, vector<8x16xf32>
    %c2_i32 = arith.constant 2 : i32
    %c8_i32_49 = arith.constant 8 : i32
    %147 = arith.muli %c2_i32, %c8_i32_49 : i32
    %148 = tpu.assume_multiple %147, 8 : i32
    %149 = arith.index_cast %148 : i32 to index
    %c0_50 = arith.constant 0 : index
    %150 = vector.load %arg14[%149, %c0_50] : memref<32x64xf32, #tpu.memory_space<vmem>>, vector<8x64xf32>
    %cst_51 = arith.constant dense<0.000000e+00> : vector<8x64xf32>
    %151 = tpu.matmul %143, %83, %cst_51 {dimension_numbers = #tpu.dot_dimension_numbers<[1], [0], [0], [1], [0, 0, 1, 1], [], []>} : vector<8x16xf32>, vector<16x64xf32>, vector<8x64xf32> -> vector<8x64xf32>
    %152 = arith.addf %150, %151 : vector<8x64xf32>
    %153 = vector.extract_strided_slice %152 {offsets = [0, 0], sizes = [8, 48], strides = [1, 1]} : vector<8x64xf32> to vector<8x48xf32>
    %154 = arith.negf %153 : vector<8x48xf32>
    %155 = math.exp %154 : vector<8x48xf32>
    %cst_52 = arith.constant 1.000000e+00 : f32
    %156 = vector.broadcast %cst_52 : f32 to vector<8x48xf32>
    %157 = arith.addf %156, %155 : vector<8x48xf32>
    %158 = arith.divf %156, %157 : vector<8x48xf32>
    %159 = vector.extract_strided_slice %152 {offsets = [0, 48], sizes = [8, 16], strides = [1, 1]} : vector<8x64xf32> to vector<8x16xf32>
    %160 = math.tanh %159 : vector<8x16xf32>
    %161 = vector.extract_strided_slice %158 {offsets = [0, 16], sizes = [8, 16], strides = [1, 1]} : vector<8x48xf32> to vector<8x16xf32>
    %162 = arith.mulf %161, %146 : vector<8x16xf32>
    %163 = vector.extract_strided_slice %158 {offsets = [0, 0], sizes = [8, 16], strides = [1, 1]} : vector<8x48xf32> to vector<8x16xf32>
    %164 = arith.mulf %163, %160 : vector<8x16xf32>
    %165 = arith.addf %162, %164 : vector<8x16xf32>
    %166 = vector.extract_strided_slice %158 {offsets = [0, 32], sizes = [8, 16], strides = [1, 1]} : vector<8x48xf32> to vector<8x16xf32>
    %167 = math.tanh %165 : vector<8x16xf32>
    %168 = arith.mulf %166, %167 : vector<8x16xf32>
    %169 = vector.broadcast %c2_i32 : i32 to vector<8x1xi32>
    %170 = arith.cmpi sgt, %84, %169 : vector<8x1xi32>
    %171 = vector.shape_cast %170 : vector<8x1xi1> to vector<8x1xi1>
    %172 = vector.broadcast %171 : vector<8x1xi1> to vector<8x16xi1>
    %173 = arith.select %172, %168, %143 : vector<8x16xi1>, vector<8x16xf32>
    %174 = vector.shape_cast %170 : vector<8x1xi1> to vector<8x1xi1>
    %175 = vector.broadcast %174 : vector<8x1xi1> to vector<8x16xi1>
    %176 = arith.select %175, %165, %146 : vector<8x16xi1>, vector<8x16xf32>
    %c3_i32 = arith.constant 3 : i32
    %c8_i32_53 = arith.constant 8 : i32
    %177 = arith.muli %c3_i32, %c8_i32_53 : i32
    %178 = tpu.assume_multiple %177, 8 : i32
    %179 = arith.index_cast %178 : i32 to index
    %c0_54 = arith.constant 0 : index
    %180 = vector.load %arg14[%179, %c0_54] : memref<32x64xf32, #tpu.memory_space<vmem>>, vector<8x64xf32>
    %cst_55 = arith.constant dense<0.000000e+00> : vector<8x64xf32>
    %181 = tpu.matmul %173, %83, %cst_55 {dimension_numbers = #tpu.dot_dimension_numbers<[1], [0], [0], [1], [0, 0, 1, 1], [], []>} : vector<8x16xf32>, vector<16x64xf32>, vector<8x64xf32> -> vector<8x64xf32>
    %182 = arith.addf %180, %181 : vector<8x64xf32>
    %183 = vector.extract_strided_slice %182 {offsets = [0, 0], sizes = [8, 48], strides = [1, 1]} : vector<8x64xf32> to vector<8x48xf32>
    %184 = arith.negf %183 : vector<8x48xf32>
    %185 = math.exp %184 : vector<8x48xf32>
    %cst_56 = arith.constant 1.000000e+00 : f32
    %186 = vector.broadcast %cst_56 : f32 to vector<8x48xf32>
    %187 = arith.addf %186, %185 : vector<8x48xf32>
    %188 = arith.divf %186, %187 : vector<8x48xf32>
    %189 = vector.extract_strided_slice %182 {offsets = [0, 48], sizes = [8, 16], strides = [1, 1]} : vector<8x64xf32> to vector<8x16xf32>
    %190 = math.tanh %189 : vector<8x16xf32>
    %191 = vector.extract_strided_slice %188 {offsets = [0, 16], sizes = [8, 16], strides = [1, 1]} : vector<8x48xf32> to vector<8x16xf32>
    %192 = arith.mulf %191, %176 : vector<8x16xf32>
    %193 = vector.extract_strided_slice %188 {offsets = [0, 0], sizes = [8, 16], strides = [1, 1]} : vector<8x48xf32> to vector<8x16xf32>
    %194 = arith.mulf %193, %190 : vector<8x16xf32>
    %195 = arith.addf %192, %194 : vector<8x16xf32>
    %196 = vector.extract_strided_slice %188 {offsets = [0, 32], sizes = [8, 16], strides = [1, 1]} : vector<8x48xf32> to vector<8x16xf32>
    %197 = math.tanh %195 : vector<8x16xf32>
    %198 = arith.mulf %196, %197 : vector<8x16xf32>
    %199 = vector.broadcast %c3_i32 : i32 to vector<8x1xi32>
    %200 = arith.cmpi sgt, %84, %199 : vector<8x1xi32>
    %201 = vector.shape_cast %200 : vector<8x1xi1> to vector<8x1xi1>
    %202 = vector.broadcast %201 : vector<8x1xi1> to vector<8x16xi1>
    %203 = arith.select %202, %198, %173 : vector<8x16xi1>, vector<8x16xf32>
    %204 = vector.shape_cast %200 : vector<8x1xi1> to vector<8x1xi1>
    %205 = vector.broadcast %204 : vector<8x1xi1> to vector<8x16xi1>
    %206 = arith.select %205, %195, %176 : vector<8x16xi1>, vector<8x16xf32>
    %c4_i32 = arith.constant 4 : i32
    %c0_57 = arith.constant 0 : index
    %c0_58 = arith.constant 0 : index
    %207 = vector.load %arg4[%c0_57, %c0_58] : memref<8x16xf32, #tpu.memory_space<vmem>>, vector<8x16xf32>
    %208 = arith.mulf %207, %203 : vector<8x16xf32>
    %c0_59 = arith.constant 0 : index
    %c0_60 = arith.constant 0 : index
    %209 = vector.load %arg11[%c0_59, %c0_60] : memref<1x16xf32, #tpu.memory_space<vmem>>, vector<1x16xf32>
    %210 = vector.broadcast %209 : vector<1x16xf32> to vector<8x16xf32>
    %211 = arith.mulf %208, %210 : vector<8x16xf32>
    %cst_61 = arith.constant dense<0.000000e+00> : vector<8xf32>
    %212 = vector.multi_reduction <add>, %211, %cst_61 [1] : vector<8x16xf32> to vector<8xf32>
    %213 = vector.shape_cast %212 : vector<8xf32> to vector<8x1xf32>
    %c0_62 = arith.constant 0 : index
    %c0_63 = arith.constant 0 : index
    %214 = memref.load %arg12[%c0_62, %c0_63] : memref<1x1xf32, #tpu.memory_space<smem>>
    %215 = vector.broadcast %214 : f32 to vector<8x1xf32>
    %216 = arith.addf %213, %215 : vector<8x1xf32>
    %c0_64 = arith.constant 0 : index
    %c0_65 = arith.constant 0 : index
    %217 = vector.load %arg5[%c0_64, %c0_65] : memref<8x1xf32, #tpu.memory_space<vmem>>, vector<8x1xf32>
    %cst_66 = arith.constant 0.000000e+00 : f32
    %218 = vector.broadcast %cst_66 : f32 to vector<8x1xf32>
    %219 = arith.maximumf %216, %218 : vector<8x1xf32>
    %220 = arith.mulf %216, %217 : vector<8x1xf32>
    %221 = arith.subf %219, %220 : vector<8x1xf32>
    %222 = math.absf %216 : vector<8x1xf32>
    %cst_67 = arith.constant 0.000000e+00 : f32
    %223 = vector.broadcast %cst_67 : f32 to vector<8x1xf32>
    %224 = arith.subf %223, %222 : vector<8x1xf32>
    %225 = math.exp %224 : vector<8x1xf32>
    %cst_68 = arith.constant 1.000000e+00 : f32
    %226 = vector.broadcast %cst_68 : f32 to vector<8x1xf32>
    %227 = arith.addf %226, %225 : vector<8x1xf32>
    %228 = math.log %227 : vector<8x1xf32>
    %229 = arith.addf %221, %228 : vector<8x1xf32>
    %c0_69 = arith.constant 0 : index
    %c0_70 = arith.constant 0 : index
    %230 = vector.load %arg13[%c0_69, %c0_70] : memref<8x1xf32, #tpu.memory_space<vmem>>, vector<8x1xf32>
    tpu.vector_store %arg13[%c0_69, %c0_70], %229 {strides = array<i32>} : memref<8x1xf32, #tpu.memory_space<vmem>>, vector<8x1xf32>,
    return
  }
  func.func @transform_0(%arg0: i32) -> (i32, i32, i32) {
    %c0_i32 = arith.constant 0 : i32
    %c0_i32_0 = arith.constant 0 : i32
    %c0_i32_1 = arith.constant 0 : i32
    return %c0_i32, %arg0, %c0_i32_0 : i32, i32, i32
  }
  func.func @transform_1(%arg0: i32) -> (i32, i32, i32) {
    %c0_i32 = arith.constant 0 : i32
    %c0_i32_0 = arith.constant 0 : i32
    %c0_i32_1 = arith.constant 0 : i32
    return %c0_i32, %arg0, %c0_i32_0 : i32, i32, i32
  }
  func.func @transform_2(%arg0: i32) -> (i32, i32) {
    %c0_i32 = arith.constant 0 : i32
    %c0_i32_0 = arith.constant 0 : i32
    return %arg0, %c0_i32 : i32, i32
  }
  func.func @transform_3(%arg0: i32) -> (i32, i32) {
    %c0_i32 = arith.constant 0 : i32
    %c0_i32_0 = arith.constant 0 : i32
    return %arg0, %c0_i32 : i32, i32
  }
  func.func @transform_4(%arg0: i32) -> (i32, i32) {
    %c0_i32 = arith.constant 0 : i32
    %c0_i32_0 = arith.constant 0 : i32
    return %arg0, %c0_i32 : i32, i32
  }
  func.func @transform_5(%arg0: i32) -> (i32, i32) {
    %c0_i32 = arith.constant 0 : i32
    %c0_i32_0 = arith.constant 0 : i32
    %c0_i32_1 = arith.constant 0 : i32
    return %c0_i32, %c0_i32_0 : i32, i32
  }
  func.func @transform_6(%arg0: i32) -> (i32, i32) {
    %c0_i32 = arith.constant 0 : i32
    %c0_i32_0 = arith.constant 0 : i32
    %c0_i32_1 = arith.constant 0 : i32
    return %c0_i32, %c0_i32_0 : i32, i32
  }
  func.func @transform_7(%arg0: i32) -> (i32, i32) {
    %c0_i32 = arith.constant 0 : i32
    %c0_i32_0 = arith.constant 0 : i32
    %c0_i32_1 = arith.constant 0 : i32
    return %c0_i32, %c0_i32_0 : i32, i32
  }
  func.func @transform_8(%arg0: i32) -> (i32, i32) {
    %c0_i32 = arith.constant 0 : i32
    %c0_i32_0 = arith.constant 0 : i32
    %c0_i32_1 = arith.constant 0 : i32
    return %c0_i32, %c0_i32_0 : i32, i32
  }
  func.func @transform_9(%arg0: i32) -> (i32, i32) {
    %c0_i32 = arith.constant 0 : i32
    %c0_i32_0 = arith.constant 0 : i32
    %c0_i32_1 = arith.constant 0 : i32
    return %c0_i32, %c0_i32_0 : i32, i32
  }
  func.func @transform_10(%arg0: i32) -> (i32, i32) {
    %c0_i32 = arith.constant 0 : i32
    %c0_i32_0 = arith.constant 0 : i32
    %c0_i32_1 = arith.constant 0 : i32
    return %c0_i32, %c0_i32_0 : i32, i32
  }
  func.func @transform_11(%arg0: i32) -> (i32, i32) {
    %c0_i32 = arith.constant 0 : i32
    %c0_i32_0 = arith.constant 0 : i32
    %c0_i32_1 = arith.constant 0 : i32
    return %c0_i32, %c0_i32_0 : i32, i32
  }
  func.func @transform_12(%arg0: i32) -> (i32, i32) {
    %c0_i32 = arith.constant 0 : i32
    %c0_i32_0 = arith.constant 0 : i32
    return %arg0, %c0_i32 : i32, i32
  }
}

</mosaic_0001>

<bundles_post_ra>
// kernel: vcr_forward_pallas.1
= control target key start
LH: loop header
LB: loop body
LE: loop exit
PB: predicated region body
PF: predicated region fallthrough
CT: control target
= control target key end

     0   :  { %s2625_s0 = inlined_call_operand.vmem [shape: f32[4,16,96], index: 0, kind: input, shape index: {}]   ;;  %s2626_s1 = inlined_call_operand.vmem [shape: f32[4,16,8], index: 1, kind: input, shape index: {}]   ;;  %s2627_s2 = inlined_call_operand.vmem [shape: s32[16,1], index: 2, kind: input, shape index: {}]   ;;  %s2628_s3 = inlined_call_operand.vmem [shape: f32[16,16], index: 3, kind: input, shape index: {}]   ;;  %s2629_s4 = inlined_call_operand.vmem [shape: f32[16,1], index: 4, kind: input, shape index: {}]   ;;  %s2630_s5 = inlined_call_operand.vmem [shape: f32[96,168], index: 5, kind: input, shape index: {}]   ;;  %s2631_s6 = inlined_call_operand.vmem [shape: f32[1,16], index: 6, kind: input, shape index: {}]   ;;  %s2632_s7 = inlined_call_operand.vmem [shape: f32[24,64], index: 7, kind: input, shape index: {}]   ;;  %s2633_s8 = inlined_call_operand.vmem [shape: f32[16,64], index: 8, kind: input, shape index: {}]   ;;  %s2634_s9 = inlined_call_operand.vmem [shape: f32[1,64], index: 9, kind: input, shape index: {}]   ;;  %s2635_s10 = inlined_call_operand.vmem [shape: f32[1,16], index: 10, kind: input, shape index: {}]   ;;  %s2636_s11 = inlined_call_operand.<no memory space> [shape: f32[1,1], index: 11, kind: input, shape index: {}]   ;;  %s2637_s12 = inlined_call_operand.vmem [shape: f32[16,1], index: 12, kind: output, shape index: {}]  }
   0x1   :  { %17 = sst [smem:[#allocation3]] %s2636_s11 }
   0x2   :  { %s2214_s23 = smov 0   ;;  %s2216_s24 = smov 0  }
   0x3   :  { %s2218_s25 = smov 0  }
   0x4 LB: > { %s1902_s11 = sadd.s32 4294967295, %s2129_s25   ;;  %s2231_s26 = sadd.s32 1, %s2129_s25   ;;  %s2129_s25 = sphi %s2218_s25, %s2641_s25   ;;  %s2125_s24 = sphi %s2216_s24, %s2640_s24   ;;  %s2121_s23 = sphi %s2214_s23, %s2639_s23  }
   0x5   : > { %s27_s27 = ssub.s32 %s2129_s25, %s2231_s26  ;;  %s30_s28 = sadd.s32 1, %s2125_s24 }
   0x6   : > { %p28_p0 = scmp.eq.s32.totalorder %s27_s27, 0  ;;  %p37_p1 = scmp.ne.s32.totalorder %s2125_s24, %s2121_s23 }
   0x7   : > { %p38_p2 = scmp.eq.s32.totalorder %s2129_s25, 0  ;;  %p1905_p4 = scmp.ge.s32.totalorder %s2129_s25, 2 }
   0x8   : > { %s2240_s29 = scalar_select %p28_p0, %s2125_s24, %s30_s28  }
   0x9   : > { %p2242_p3 = por %p38_p2, %p37_p1  ;;  %361 = sbr.rel (%p1905_p4) target bundleno = 26 (0x1a), region = 44 }
   0xe   : > { %364 = sbr.rel (!%p2242_p3) target bundleno = 20 (0x14), region = 48  ;;  %s366_s13 = sand.u32 (%p2242_p3), 1, %s2125_s24  }
   0xf   : > { %s1907_s14 = sshll.u32 (%p2242_p3), %s2129_s25, 3  ;;  %s1906_s15 = sshll.u32 (%p2242_p3), %s366_s13, 5 }
  0x10   : > { %s370_s18 = scalar_lea.vmem (%p2242_p3), %s2625_s0, %s1907_s14  ;;  %s368_s19 = scalar_lea.vmem (%p2242_p3), [#allocation4], %s1906_s15 }
  0x11   : > { %v405_v0 = vld [vmem:[%s370_s18] sm:$0xff] (%p2242_p3)  ;;  %v407_v1 = vld [vmem:[%s370_s18 + $0x10] sm:$0xff] (%p2242_p3) }
  0x12   : > { %v409_v2 = vld [vmem:[%s370_s18 + $0x20] sm:$0xff] (%p2242_p3)  ;;  %406 = vst [vmem:[%s368_s19] sm:$0xff] (%p2242_p3), %v405_v0  ;;  %408 = vst [vmem:[%s368_s19 + $0x8] sm:$0xff] (%p2242_p3), %v407_v1  ;;  %v411_v3 = vld [vmem:[%s370_s18 + $0x30] sm:$0xff] (%p2242_p3) }
  0x13   : > { %410 = vst [vmem:[%s368_s19 + $0x10] sm:$0xff] %v409_v2  ;;  %412 = vst [vmem:[%s368_s19 + $0x18] sm:$0xff] %v411_v3 }
  0x14 PF: > { %418 = sbr.rel (!%p2242_p3) target bundleno = 26 (0x1a), region = 86  ;;  %s420_s20 = sand.u32 (%p2242_p3), 1, %s2125_s24  }
  0x15   : > { %s1909_s21 = sshll.u32 (%p2242_p3), %s2129_s25, 3  ;;  %s1908_s22 = sshll.u32 (%p2242_p3), %s420_s20, 5 }
  0x16   : > { %s424_s13 = scalar_lea.vmem (%p2242_p3), %s2626_s1, %s1909_s21  ;;  %s422_s14 = scalar_lea.vmem (%p2242_p3), [#allocation5], %s1908_s22 }
  0x17   : > { %v459_v4 = vld [vmem:[%s424_s13] sm:$0xff] (%p2242_p3)  ;;  %v461_v5 = vld [vmem:[%s424_s13 + $0x10] sm:$0xff] (%p2242_p3) }
  0x18   : > { %v463_v6 = vld [vmem:[%s424_s13 + $0x20] sm:$0xff] (%p2242_p3)  ;;  %460 = vst [vmem:[%s422_s14] sm:$0xff] (%p2242_p3), %v459_v4  ;;  %462 = vst [vmem:[%s422_s14 + $0x8] sm:$0xff] (%p2242_p3), %v461_v5  ;;  %v465_v7 = vld [vmem:[%s424_s13 + $0x30] sm:$0xff] (%p2242_p3) }
  0x19   : > { %464 = vst [vmem:[%s422_s14 + $0x10] sm:$0xff] %v463_v6  ;;  %466 = vst [vmem:[%s422_s14 + $0x18] sm:$0xff] %v465_v7 }
  0x1a PF: > { %p1910_p5 = scmp.ge.s32.totalorder %s2129_s25, 1  ;;  %p492_p6 = scmp.lt.s32.totalorder %s2129_s25, 3 }
  0x1c   : > { %p493_p7 = pnand %p1910_p5, %p492_p6 }
  0x1d   : > { %s2132_s16 = smov (!%p493_p7), 80   ;;  %s499_s27 = sand.u32 (!%p493_p7), 1, %s2121_s23  }
  0x1e   : > { %496 = sbr.rel (%p493_p7) target bundleno = 3523 (0xdc3), region = 136  ;;  %s2329_s18 = sshll.u32 (!%p493_p7), %s499_s27, 5 }
  0x1f   : > { %s501_s15 = scalar_lea.vmem (!%p493_p7), [#allocation4], %s2329_s18  ;;  %s2133_s17 = smov (!%p493_p7), 112  }
  0x20   : > { %s2134_s23 = smov (!%p493_p7), 120   ;;  %s2135_s19 = smov (!%p493_p7), 88  }
  0x21   : > { %s2136_s20 = smov (!%p493_p7), 104   ;;  %s2137_s21 = smov (!%p493_p7), 96  }
  0x22   : > { %s2138_s22 = smov (!%p493_p7), 72   ;;  %s2139_s28 = smov (!%p493_p7), 64  }
  0x23   : > { %v608_v8 = vld [vmem:[%s2630_s5 + $0xb8] sm:$0xff]  ;;  %v607_v9 = vld [vmem:[%s2630_s5 + $0xb0] sm:$0xff]  ;;  %v606_v10 = vld [vmem:[%s2630_s5 + $0xa8] sm:$0xff]  ;;  %v2131_v12 = vmov 0.0   ;;  %vm609_vm0 = vcmask 785408   ;;  %s2140_s13 = smov 56  }
  0x24   : > { %630 = vmatprep.subr.mxu0 %v608_v8  ;;  %v605_v11 = vld [vmem:[%s2630_s5 + $0xa0] sm:$0xff]  ;;  %686 = vmatprep.mubr.f32.mxu0 %v2131_v12  ;;  %v604_v13 = vld [vmem:[%s2630_s5 + $0x98] sm:$0xff]  ;;  %v603_v14 = vld [vmem:[%s2630_s5 + $0x90] sm:$0xff]  ;;  %s2141_s30 = smov 48   ;;  %vm995_vm1 = vcmask 64512   ;;  %vm2143_vm2 = vmmov 0  }
  0x25   : > { %631 = vmatpush1.msra.mxu0 %v607_v9  ;;  %v602_v15 = vld [vmem:[%s2630_s5 + $0x88] sm:$0xff]  ;;  %v601_v16 = vld [vmem:[%s2630_s5 + $0x80] sm:$0xff]  ;;  %v600_v17 = vld [vmem:[%s2630_s5 + $0x78] sm:$0xff]  ;;  %vm1310_vm3 = vcmask 523264   ;;  %p562_p8 = scmp.lt.s32.totalorder %s1902_s11, 1  ;;  %s2145_s25 = smov 16  }
  0x26   : > { %632 = vmatprep.subr.mxu0 %v606_v10  ;;  %v599_v18 = vld [vmem:[%s2630_s5 + $0x70] sm:$0xff]  ;;  %v598_v19 = vld [vmem:[%s2630_s5 + $0x68] sm:$0xff]  ;;  %v597_v20 = vld [vmem:[%s2630_s5 + $0x60] sm:$0xff]  ;;  %vm1319_vm6 = vcmask 130048   ;;  %vm1787_vm13 = vcmask 7168  }
  0x27   : > { %633 = vmatpush1.msra.mxu0 %v605_v11  ;;  %v2303_v21 = vld [vmem:[%s2631_s6] ss:$0 sm:$0xff]  ;;  %v596_v22 = vld [vmem:[%s2630_s5 + $0x58] sm:$0xff]  ;;  %v595_v23 = vld [vmem:[%s2630_s5 + $0x50] sm:$0xff]  ;;  %s2643_s11 = smov (!%p562_p8, %s1902_s11), 1 }
  0x28   : > { %634 = vmatprep.subr.mxu0 %v604_v13  ;;  %974 = vrot.lane.b32.xlu1 %v2303_v21, %s2132_s16  ;;  %v594_v24 = vld [vmem:[%s2630_s5 + $0x48] sm:$0xff]  ;;  %v593_v25 = vld [vmem:[%s2630_s5 + $0x40] sm:$0xff]  ;;  %v592_v26 = vld [vmem:[%s2630_s5 + $0x38] sm:$0xff] }
  0x29   : > { %635 = vmatpush1.msra.mxu0 %v603_v14  ;;  %v591_v27 = vld [vmem:[%s2630_s5 + $0x30] sm:$0xff]  ;;  %v590_v28 = vld [vmem:[%s2630_s5 + $0x28] sm:$0xff]  ;;  %v589_v29 = vld [vmem:[%s2630_s5 + $0x20] sm:$0xff] }
  0x2a   : > { %636 = vmatprep.subr.mxu0 %v602_v15  ;;  %v588_v30 = vld [vmem:[%s2630_s5 + $0x18] sm:$0xff]  ;;  %v587_v31 = vld [vmem:[%s2630_s5 + $0x10] sm:$0xff]  ;;  %v586_v32 = vld [vmem:[%s2630_s5 + $0x8] sm:$0xff] }
  0x2b   : > { %637 = vmatpush1.msra.mxu0 %v601_v16  ;;  %v585_v33 = vld [vmem:[%s2630_s5] sm:$0xff]  ;;  %v1917_v35 = vld [vmem:[%s501_s15 + $0x8] sm:$0xff]  ;;  %v1918_v36 = vld [vmem:[%s501_s15 + $0x10] sm:$0xff] }
  0x2c   : > { %638 = vmatprep.subr.mxu0 %v600_v17  ;;  %v578_v34 = vld [vmem:[%s501_s15] sm:$0xff]  ;;  %v1919_v37 = vld [vmem:[%s501_s15 + $0x18] sm:$0xff]  ;;  %v2459_v48 = vld [vmem:[%s2632_s7 + $0x10] sm:$0xff]  ;;  %s2547_s15 = sshll.u32 %s2643_s11, 3 }
  0x2d   : > { %639 = vmatpush1.msra.mxu0 %v599_v18  ;;  %v985_v46 = vld [vmem:[%s2632_s7] sm:$0xff]  ;;  %s573_s27 = scalar_lea.vmem %s2629_s4, %s2547_s15 }
  0x2e   : > { %640 = vmatprep.subr.mxu0 %v598_v19  ;;  %1978 = vmatprep.subr.mxu1 %v985_v46 }
  0x2f   : > { %641 = vmatpush1.msra.mxu0 %v597_v20  ;;  %1979 = vmatpush3.msra.mxu1 %v985_v46 }
  0x30   : > { %642 = vmatprep.subr.mxu0 %v596_v22  ;;  %1986 = vmatprep.subr.mxu1 %v2459_v48 }
  0x31   : > { %643 = vmatpush1.msra.mxu0 %v595_v23 }
  0x32   : > { %644 = vmatprep.subr.mxu0 %v594_v24 }
  0x33   : > { %645 = vmatpush1.msra.mxu0 %v593_v25 }
  0x34   : > { %646 = vmatprep.subr.mxu0 %v592_v26 }
  0x35   : > { %647 = vmatpush1.msra.mxu0 %v591_v27 }
  0x36   : > { %648 = vmatprep.subr.mxu0 %v590_v28 }
  0x37   : > { %649 = vmatpush1.msra.mxu0 %v589_v29 }
  0x38   : > { %650 = vmatprep.subr.mxu0 %v588_v30 }
  0x39   : > { %651 = vmatpush1.msra.mxu0 %v587_v31 }
  0x3a   : > { %652 = vmatprep.subr.mxu0 %v586_v32 }
  0x3b   : > { %653 = vmatpush1.msra.mxu0 %v585_v33 }
  0x3c   : > { %1920 = vmatmul.mubr.msk.f32.vlgmr.msra.gmra.mxu0 %vm609_vm0, %v578_v34 }
  0x3d   : > { %692 = vmatprep.mubr.f32.mxu0 %v2131_v12 }
  0x40   : > { %1921 = vmatmul.mubr.msk.f32.gmra.mxu0 %vm609_vm0, %v1917_v35 }
  0x41   : > { %698 = vmatprep.mubr.f32.mxu0 %v2131_v12 }
  0x44   : > { %1922 = vmatmul.mubr.msk.f32.gmra.mxu0 %vm609_vm0, %v1918_v36 }
  0x45   : > { %704 = vmatprep.mubr.f32.mxu0 %v2131_v12 }
  0x48   : > { %1923 = vmatmul.mubr.msk.f32.gmra.mxu0 %vm609_vm0, %v1919_v37 }
  0x9a   : > { %v2452_v47 = vpop.permute.xlu1 %974 }
  0xfc   : > { %v2350_v38 = vpop.f32.mrf.mxu0 }
  0xfd   : > { %731 = vrot.lane.b32.xlu1 %v2350_v38, %s2133_s17  ;;  %715 = vrot.lane.b32.xlu0 %v2350_v38, %s2134_s23 }
  0xfe   : > { %v690_v39 = vpop.f32.mrf.mxu0 }
 0x100   : > { %v2369_v40 = vpop.f32.mrf.mxu0 }
 0x101   : > { %779 = vrot.lane.b32.xlu1 %v2350_v38, %s2135_s19  ;;  %747 = vrot.lane.b32.xlu0 %v2350_v38, %s2136_s20 }
 0x102   : > { %v696_v41 = vpop.f32.mrf.mxu0 }
 0x104   : > { %v2381_v42 = vpop.f32.mrf.mxu0 }
 0x105   : > { %795 = vrot.lane.b32.xlu1 %v2350_v38, %s2132_s16  ;;  %763 = vrot.lane.b32.xlu0 %v2350_v38, %s2137_s21 }
 0x106   : > { %v702_v43 = vpop.f32.mrf.mxu0 }
 0x108   : > { %v2399_v44 = vpop.f32.mrf.mxu0 }
 0x109   : > { %811 = vrot.lane.b32.xlu0 %v2350_v38, %s2138_s22  ;;  %910 = vrot.lane.b32.xlu1 %v690_v39, %s2132_s16 }
 0x10a   : > { %v708_v45 = vpop.f32.mrf.mxu0 }
 0x10d   : > { %926 = vrot.lane.b32.xlu1 %v690_v39, %s2138_s22  ;;  %894 = vrot.lane.b32.xlu0 %v690_v39, %s2135_s19 }
 0x111   : > { %942 = vrot.lane.b32.xlu1 %v690_v39, %s2139_s28  ;;  %717 = vrot.lane.b32.xlu0 %v2369_v40, %s2134_s23 }
 0x115   : > { %958 = vrot.lane.b32.xlu1 %v690_v39, %s2140_s13  ;;  %781 = vrot.lane.b32.xlu0 %v2369_v40, %s2135_s19 }
 0x119   : > { %733 = vrot.lane.b32.xlu1 %v2369_v40, %s2133_s17  ;;  %797 = vrot.lane.b32.xlu0 %v2369_v40, %s2132_s16 }
 0x11d   : > { %749 = vrot.lane.b32.xlu1 %v2369_v40, %s2136_s20  ;;  %719 = vrot.lane.b32.xlu0 %v2381_v42, %s2134_s23 }
 0x121   : > { %765 = vrot.lane.b32.xlu1 %v2369_v40, %s2137_s21  ;;  %735 = vrot.lane.b32.xlu0 %v2381_v42, %s2133_s17 }
 0x125   : > { %896 = vrot.lane.b32.xlu1 %v696_v41, %s2135_s19  ;;  %751 = vrot.lane.b32.xlu0 %v2381_v42, %s2136_s20 }
 0x129   : > { %912 = vrot.lane.b32.xlu1 %v696_v41, %s2132_s16  ;;  %767 = vrot.lane.b32.xlu0 %v2381_v42, %s2137_s21 }
 0x12d   : > { %928 = vrot.lane.b32.xlu1 %v696_v41, %s2138_s22  ;;  %898 = vrot.lane.b32.xlu0 %v702_v43, %s2135_s19 }
 0x131   : > { %944 = vrot.lane.b32.xlu1 %v696_v41, %s2139_s28  ;;  %721 = vrot.lane.b32.xlu0 %v2399_v44, %s2134_s23  ;;  %s2142_s23 = smov 40  }
 0x135   : > { %960 = vrot.lane.b32.xlu1 %v696_v41, %s2140_s13  ;;  %737 = vrot.lane.b32.xlu0 %v2399_v44, %s2133_s17  ;;  %s577_s17 = scalar_lea.vmem %s2637_s12, %s2547_s15 }
 0x139   : > { %783 = vrot.lane.b32.xlu1 %v2381_v42, %s2135_s19  ;;  %753 = vrot.lane.b32.xlu0 %v2399_v44, %s2136_s20  ;;  %s569_s20 = scalar_lea.vmem %s2628_s3, %s2547_s15 }
 0x13d   : > { %914 = vrot.lane.b32.xlu1 %v702_v43, %s2132_s16  ;;  %769 = vrot.lane.b32.xlu0 %v2399_v44, %s2137_s21 }
 0x141   : > { %930 = vrot.lane.b32.xlu1 %v702_v43, %s2138_s22  ;;  %900 = vrot.lane.b32.xlu0 %v708_v45, %s2135_s19 }
 0x145   : > { %946 = vrot.lane.b32.xlu1 %v702_v43, %s2139_s28  ;;  %916 = vrot.lane.b32.xlu0 %v708_v45, %s2132_s16 }
 0x149   : > { %962 = vrot.lane.b32.xlu1 %v702_v43, %s2140_s13  ;;  %932 = vrot.lane.b32.xlu0 %v708_v45, %s2138_s22 }
 0x14d   : > { %785 = vrot.lane.b32.xlu1 %v2399_v44, %s2135_s19  ;;  %948 = vrot.lane.b32.xlu0 %v708_v45, %s2139_s28  ;;  %s565_s19 = scalar_lea.vmem %s2627_s2, %s2547_s15 }
 0x151   : > { %799 = vrot.lane.b32.xlu1 %v2381_v42, %s2132_s16  ;;  %964 = vrot.lane.b32.xlu0 %v708_v45, %s2140_s13 }
 0x155   : > { %801 = vrot.lane.b32.xlu1 %v2399_v44, %s2132_s16  ;;  %813 = vrot.lane.b32.xlu0 %v2369_v40, %s2138_s22 }
 0x159   : > { %815 = vrot.lane.b32.xlu1 %v2381_v42, %s2138_s22  ;;  %827 = vrot.lane.b32.xlu0 %v2350_v38, %s2139_s28 }
 0x15d   : > { %817 = vrot.lane.b32.xlu1 %v2399_v44, %s2138_s22  ;;  %829 = vrot.lane.b32.xlu0 %v2369_v40, %s2139_s28  ;;  %s508_s22 = scalar_lea.vmem [#allocation5], %s2329_s18 }
 0x161   : > { %831 = vrot.lane.b32.xlu1 %v2381_v42, %s2139_s28  ;;  %843 = vrot.lane.b32.xlu0 %v2350_v38, %s2140_s13 }
 0x165   : > { %833 = vrot.lane.b32.xlu1 %v2399_v44, %s2139_s28  ;;  %845 = vrot.lane.b32.xlu0 %v2369_v40, %s2140_s13  ;;  %s1772_s28 = sld [smem:[#allocation3]] }
 0x169   : > { %847 = vrot.lane.b32.xlu1 %v2381_v42, %s2140_s13  ;;  %859 = vrot.lane.b32.xlu0 %v2350_v38, %s2141_s30 }
 0x16d   : > { %863 = vrot.lane.b32.xlu1 %v2381_v42, %s2141_s30  ;;  %861 = vrot.lane.b32.xlu0 %v2369_v40, %s2141_s30 }
 0x16f   : > { %v732_v49 = vpop.permute.xlu1 %731  ;;  %v716_v50 = vpop.permute.xlu0 %715 }
 0x170   : > { %v727_v51 = vmax.f32 %v2350_v38, %v716_v50 }
 0x171   : > { %849 = vrot.lane.b32.xlu0 %v2399_v44, %s2140_s13 }
 0x172   : > { %v743_v52 = vmax.f32 %v727_v51, %v732_v49 }
 0x173   : > { %v780_v53 = vpop.permute.xlu1 %779  ;;  %v748_v54 = vpop.permute.xlu0 %747 }
 0x174   : > { %v759_v55 = vmax.f32 %v743_v52, %v748_v54 }
 0x175   : > { %865 = vrot.lane.b32.xlu0 %v2399_v44, %s2141_s30 }
 0x177   : > { %v796_v56 = vpop.permute.xlu1 %795  ;;  %v764_v57 = vpop.permute.xlu0 %763 }
 0x178   : > { %v775_v58 = vmax.f32 %v759_v55, %v764_v57 }
 0x17a   : > { %v791_v59 = vmax.f32 %v775_v58, %v780_v53 }
 0x17b   : > { %v2466_v60 = vpop.permute.xlu0 %811  ;;  %v911_v61 = vpop.permute.xlu1 %910 }
 0x17c   : > { %v2468_v62 = vmax.f32 %v791_v59, %v796_v56 }
 0x17e   : > { %v823_v63 = vmax.f32 %v2468_v62, %v2466_v60 }
 0x17f   : > { %v927_v0 = vpop.permute.xlu1 %926  ;;  %v895_v1 = vpop.permute.xlu0 %894 }
 0x180   : > { %v906_v2 = vmax.f32 %v775_v58, %v895_v1 }
 0x182   : > { %v922_v3 = vmax.f32 %v906_v2, %v911_v61 }
 0x183   : > { %v943_v4 = vpop.permute.xlu1 %942  ;;  %v718_v5 = vpop.permute.xlu0 %717 }
 0x184   : > { %v938_v6 = vmax.f32 %v922_v3, %v927_v0  ;;  %v728_v16 = vmax.f32 %v2369_v40, %v718_v5 }
 0x186   : > { %v954_v7 = vmax.f32 %v938_v6, %v943_v4 }
 0x187   : > { %v959_v8 = vpop.permute.xlu1 %958  ;;  %v782_v9 = vpop.permute.xlu0 %781 }
 0x188   : > { %v970_v10 = vmax.f32 %v954_v7, %v959_v8 }
 0x18a   : > { %v977_v11 = vadd.f32 %v2452_v47, %v970_v10 }
 0x18b   : > { %v734_v13 = vpop.permute.xlu1 %733  ;;  %v798_v14 = vpop.permute.xlu0 %797 }
 0x18c   : > { %v981_v15 = vmax.f32 %v977_v11, 0.0  ;;  %v744_v19 = vmax.f32 %v728_v16, %v734_v13 }
 0x18e   : > { %1194 = vrot.lane.b32.xlu1 %v981_v15, %s2142_s23 }
 0x18f   : > { %v750_v17 = vpop.permute.xlu1 %749  ;;  %v720_v18 = vpop.permute.xlu0 %719 }
 0x190   : > { %v760_v20 = vmax.f32 %v744_v19, %v750_v17  ;;  %v729_v49 = vmax.f32 %v2381_v42, %v720_v18 }
 0x193   : > { %v766_v22 = vpop.permute.xlu1 %765  ;;  %v736_v23 = vpop.permute.xlu0 %735 }
 0x194   : > { %v776_v24 = vmax.f32 %v760_v20, %v766_v22  ;;  %v745_v51 = vmax.f32 %v729_v49, %v736_v23 }
 0x196   : > { %v792_v25 = vmax.f32 %v776_v24, %v782_v9 }
 0x197   : > { %v897_v26 = vpop.permute.xlu1 %896  ;;  %v752_v27 = vpop.permute.xlu0 %751 }
 0x198   : > { %v2475_v28 = vmax.f32 %v792_v25, %v798_v14  ;;  %v907_v33 = vmax.f32 %v776_v24, %v897_v26  ;;  %v761_v54 = vmax.f32 %v745_v51, %v752_v27 }
 0x19b   : > { %v913_v29 = vpop.permute.xlu1 %912  ;;  %v768_v30 = vpop.permute.xlu0 %767 }
 0x19c   : > { %v923_v34 = vmax.f32 %v907_v33, %v913_v29  ;;  %v777_v55 = vmax.f32 %v761_v54, %v768_v30 }
 0x19f   : > { %v929_v31 = vpop.permute.xlu1 %928  ;;  %v899_v32 = vpop.permute.xlu0 %898 }
 0x1a0   : > { %v939_v37 = vmax.f32 %v923_v34, %v929_v31  ;;  %v908_v58 = vmax.f32 %v777_v55, %v899_v32 }
 0x1a3   : > { %v945_v35 = vpop.permute.xlu1 %944  ;;  %v722_v36 = vpop.permute.xlu0 %721 }
 0x1a4   : > { %v955_v38 = vmax.f32 %v939_v37, %v945_v35  ;;  %v730_v59 = vmax.f32 %v2399_v44, %v722_v36 }
 0x1a7   : > { %v961_v39 = vpop.permute.xlu1 %960  ;;  %v738_v40 = vpop.permute.xlu0 %737 }
 0x1a8   : > { %v971_v41 = vmax.f32 %v955_v38, %v961_v39  ;;  %v746_v61 = vmax.f32 %v730_v59, %v738_v40 }
 0x1aa   : > { %v978_v43 = vadd.f32 %v2452_v47, %v971_v41 }
 0x1ab   : > { %v784_v45 = vpop.permute.xlu1 %783  ;;  %v754_v46 = vpop.permute.xlu0 %753 }
 0x1ac   : > { %v982_v50 = vmax.f32 %v978_v43, 0.0  ;;  %v762_v3 = vmax.f32 %v746_v61, %v754_v46  ;;  %v793_v32 = vmax.f32 %v777_v55, %v784_v45 }
 0x1ae   : > { %1196 = vrot.lane.b32.xlu0 %v982_v50, %s2142_s23 }
 0x1af   : > { %v915_v52 = vpop.permute.xlu1 %914  ;;  %v770_v53 = vpop.permute.xlu0 %769 }
 0x1b0   : > { %v924_v0 = vmax.f32 %v908_v58, %v915_v52  ;;  %v778_v42 = vmax.f32 %v762_v3, %v770_v53 }
 0x1b3   : > { %v931_v56 = vpop.permute.xlu1 %930  ;;  %v901_v57 = vpop.permute.xlu0 %900 }
 0x1b4   : > { %v940_v4 = vmax.f32 %v924_v0, %v931_v56  ;;  %v909_v8 = vmax.f32 %v778_v42, %v901_v57  ;;  %v986_v0 = vld [vmem:[%s2632_s7 + $0x8] sm:$0xff] }
 0x1b7   : > { %v947_v1 = vpop.permute.xlu1 %946  ;;  %v917_v2 = vpop.permute.xlu0 %916 }
 0x1b8   : > { %v956_v5 = vmax.f32 %v940_v4, %v947_v1  ;;  %v925_v10 = vmax.f32 %v909_v8, %v917_v2  ;;  %v1927_v8 = vld [vmem:[%s508_s22 + $0x18] sm:$0xff] }
 0x1bb   : > { %v963_v6 = vpop.permute.xlu1 %962  ;;  %v933_v7 = vpop.permute.xlu0 %932 }
 0x1bc   : > { %v972_v9 = vmax.f32 %v956_v5, %v963_v6  ;;  %v941_v16 = vmax.f32 %v925_v10, %v933_v7  ;;  %v988_v5 = vld [vmem:[%s508_s22] sm:$0xff]  ;;  %v1925_v6 = vld [vmem:[%s508_s22 + $0x8] sm:$0xff]  ;;  %v1926_v7 = vld [vmem:[%s508_s22 + $0x10] sm:$0xff] }
 0x1bd   : > { %v2517_v10 = vld [vmem:[%s2633_s8] sm:$0xff] }
 0x1be   : > { %v979_v11 = vadd.f32 %v2452_v47, %v972_v9 }
 0x1bf   : > { %v786_v13 = vpop.permute.xlu1 %785  ;;  %v949_v14 = vpop.permute.xlu0 %948 }
 0x1c0   : > { %v983_v15 = vmax.f32 %v979_v11, 0.0  ;;  %v957_v44 = vmax.f32 %v941_v16, %v949_v14  ;;  %v794_v49 = vmax.f32 %v778_v42, %v786_v13  ;;  %v2144_v14 = vmov 0  }
 0x1c1   : > { %2069 = vset.pattern.permute.xlu1 %v2144_v14  ;;  %2070 = vset.pattern.permute.xlu0 %v2144_v14 }
 0x1c2   : > { %1198 = vrot.lane.b32.xlu1 %v983_v15, %s2142_s23 }
 0x1c3   : > { %v800_v17 = vpop.permute.xlu1 %799  ;;  %v965_v18 = vpop.permute.xlu0 %964 }
 0x1c4   : > { %v973_v19 = vmax.f32 %v957_v44, %v965_v18  ;;  %v809_v35 = vmax.f32 %v793_v32, %v800_v17 }
 0x1c6   : > { %v980_v20 = vadd.f32 %v2452_v47, %v973_v19 }
 0x1c7   : > { %v802_v22 = vpop.permute.xlu1 %801  ;;  %v814_v23 = vpop.permute.xlu0 %813 }
 0x1c8   : > { %v984_v24 = vmax.f32 %v980_v20, 0.0  ;;  %v824_v47 = vmax.f32 %v2475_v28, %v814_v23  ;;  %v810_v54 = vmax.f32 %v794_v49, %v802_v22  ;;  %v2553_v49 = vld [vmem:[%s565_s19] sm:$0xff] }
 0x1c9   : > { %vm1418_vm4 = vcmp.gt.s32.totalorder %v2553_v49, 0  ;;  %vm1528_vm7 = vcmp.gt.s32.totalorder %v2553_v49, 1  ;;  %vm1638_vm9 = vcmp.gt.s32.totalorder %v2553_v49, 2  ;;  %vm1748_vm11 = vcmp.gt.s32.totalorder %v2553_v49, 3 }
 0x1ca   : > { %1200 = vrot.lane.b32.xlu0 %v984_v24, %s2142_s23 }
 0x1cb   : > { %v816_v25 = vpop.permute.xlu1 %815  ;;  %v828_v26 = vpop.permute.xlu0 %827 }
 0x1cc   : > { %v839_v36 = vmax.f32 %v823_v63, %v828_v26  ;;  %v825_v37 = vmax.f32 %v809_v35, %v816_v25  ;;  %v1940_v25 = vld [vmem:[%s2634_s9] ss:$0 sm:$0xff] }
 0x1cf   : > { %v818_v27 = vpop.permute.xlu1 %817  ;;  %v830_v29 = vpop.permute.xlu0 %829 }
 0x1d0   : > { %v840_v41 = vmax.f32 %v824_v47, %v830_v29  ;;  %v826_v28 = vmax.f32 %v810_v54, %v818_v27 }
 0x1d3   : > { %v832_v30 = vpop.permute.xlu1 %831  ;;  %v844_v31 = vpop.permute.xlu0 %843 }
 0x1d4   : > { %v855_v38 = vmax.f32 %v839_v36, %v844_v31  ;;  %v841_v43 = vmax.f32 %v825_v37, %v832_v30 }
 0x1d7   : > { %v834_v33 = vpop.permute.xlu1 %833  ;;  %v846_v34 = vpop.permute.xlu0 %845 }
 0x1d8   : > { %v856_v50 = vmax.f32 %v840_v41, %v846_v34  ;;  %v842_v58 = vmax.f32 %v826_v28, %v834_v33 }
 0x1db   : > { %v848_v39 = vpop.permute.xlu1 %847  ;;  %v860_v40 = vpop.permute.xlu0 %859 }
 0x1dc   : > { %v871_v46 = vmax.f32 %v855_v38, %v860_v40  ;;  %v857_v51 = vmax.f32 %v841_v43, %v848_v39 }
 0x1de   : > { %v882_v45 = vadd.f32 %v2303_v21, %v871_v46 }
 0x1df   : > { %v864_v52 = vpop.permute.xlu1 %863  ;;  %v862_v53 = vpop.permute.xlu0 %861 }
 0x1e0   : > { %v873_v60 = vmax.f32 %v857_v51, %v864_v52  ;;  %v872_v62 = vmax.f32 %v856_v50, %v862_v53  ;;  %v886_v63 = vmax.f32 %v882_v45, 0.0  ;;  %v1419_v51 = vsel %vm1418_vm4, 1, %v2144_v14 }
 0x1e2   : > { %v884_v55 = vadd.f32 %v2303_v21, %v873_v60  ;;  %v883_v56 = vadd.f32 %v2303_v21, %v872_v62  ;;  %1980 = vmatprep.mubr.msk.f32.mxu1 %vm995_vm1, %v886_v63 }
 0x1e3   : > { %v850_v57 = vpop.permute.xlu0 %849 }
 0x1e4   : > { %v888_v59 = vmax.f32 %v884_v55, 0.0  ;;  %v887_v61 = vmax.f32 %v883_v56, 0.0  ;;  %v858_v1 = vmax.f32 %v842_v58, %v850_v57 }
 0x1e6   : > { %1981 = vmatmul.mubr.msk.f32.vlgmr.msra.gmra.mxu1 %vm995_vm1, %v887_v61 }
 0x1e7   : > { %1983 = vmatprep.mubr.msk.f32.mxu1 %vm995_vm1, %v888_v59  ;;  %v866_v2 = vpop.permute.xlu0 %865  ;;  %1987 = vmatpush3.msra.mxu1 %v2459_v48  ;;  %v2511_v48 = vld [vmem:[%s2633_s8 + $0x8] sm:$0xff] }
 0x1e8   : > { %v874_v3 = vmax.f32 %v858_v1, %v866_v2  ;;  %1994 = vmatprep.subr.mxu1 %v986_v0 }
 0x1ea   : > { %v885_v4 = vadd.f32 %v2303_v21, %v874_v3 }
 0x1ec   : > { %v889_v42 = vmax.f32 %v885_v4, 0.0 }
 0x1ee   : > { %1984 = vmatmul.mubr.msk.f32.gmra.mxu1 %vm995_vm1, %v889_v42 }
 0x1ef   : > { %1988 = vmatprep.mubr.msk.f32.mxu1 %vm995_vm1, %v988_v5  ;;  %v1529_v5 = vsel %vm1528_vm7, 1, %v2144_v14 }
 0x1f2   : > { %1989 = vmatmul.mubr.msk.f32.vlgmr.msra.gmra.mxu1 %vm995_vm1, %v1925_v6 }
 0x1f3   : > { %1991 = vmatprep.mubr.msk.f32.mxu1 %vm995_vm1, %v1926_v7  ;;  %1995 = vmatpush3.msra.mxu1 %v986_v0 }
 0x1f4   : > { %2002 = vmatprep.subr.mxu1 %v2131_v12 }
 0x1f6   : > { %1992 = vmatmul.mubr.msk.f32.gmra.mxu1 %vm995_vm1, %v1927_v8 }
 0x200   : > { %v1195_v21 = vpop.permute.xlu1 %1194 }
 0x201   : > { %1996 = vmatprep.mubr.msk.f32.mxu1 %vm995_vm1, %v1195_v21 }
 0x220   : > { %v1197_v9 = vpop.permute.xlu0 %1196 }
 0x221   : > { %1997 = vmatmul.mubr.msk.f32.vlgmr.msra.gmra.mxu1 %vm995_vm1, %v1197_v9 }
 0x222   : > { %2003 = vmatpush3.msra.mxu1 %v2511_v48 }
 0x223   : > { %2004 = vmatprep.subr.mxu1 %v2131_v12 }
 0x224   : > { %2005 = vmatpush3.msra.mxu1 %v2517_v10 }
 0x225   : > { %2009 = vmatprep.subr.mxu1 %v2131_v12 }
 0x234   : > { %v1199_v11 = vpop.permute.xlu1 %1198 }
 0x235   : > { %1999 = vmatprep.mubr.msk.f32.mxu1 %vm995_vm1, %v1199_v11 }
 0x23c   : > { %v1201_v13 = vpop.permute.xlu0 %1200 }
 0x23d   : > { %2000 = vmatmul.mubr.msk.f32.gmra.mxu1 %vm995_vm1, %v1201_v13 }
 0x23e   : > { %2006 = vmatprep.mubr.msk.f32.mxu1 %vm2143_vm2, %v2131_v12 }
 0x241   : > { %2007 = vmatmul.mubr.f32.vlgmr.msra.gmra.mxu1 %v2131_v12 }
 0x242   : > { %2010 = vmatpush3.msra.mxu1 %v2511_v48  ;;  %2013 = vmatprep.mubr.msk.f32.mxu1 %vm2143_vm2, %v2131_v12 }
 0x243   : > { %2011 = vmatprep.subr.mxu1 %v2131_v12 }
 0x244   : > { %2012 = vmatpush3.msra.mxu1 %v2517_v10 }
 0x245   : > { %2016 = vmatprep.subr.mxu1 %v2131_v12 }
 0x2a6   : > { %v1982_v15 = vpop.f32.mrf.mxu1 }
 0x2a8   : > { %v1074_v16 = vpop.f32.mrf.mxu1 }
 0x2ae   : > { %v1985_v44 = vpop.f32.mrf.mxu1 }
 0x2b0   : > { %v1084_v17 = vpop.f32.mrf.mxu1 }
 0x2b2   : > { %v1990_v18 = vpop.f32.mrf.mxu1 }
 0x2b3   : > { %v1177_v23 = vadd.f32 %v1990_v18, %v1982_v15 }
 0x2b4   : > { %v1171_v19 = vpop.f32.mrf.mxu1 }
 0x2b5   : > { %v1172_v26 = vadd.f32 %v1171_v19, %v1074_v16 }
 0x2b6   : > { %v1993_v20 = vpop.f32.mrf.mxu1 }
 0x2b7   : > { %v1187_v33 = vadd.f32 %v1993_v20, %v1985_v44 }
 0x2b8   : > { %v1181_v22 = vpop.f32.mrf.mxu1 }
 0x2b9   : > { %v1182_v35 = vadd.f32 %v1181_v22, %v1084_v17 }
 0x2e1   : > { %v1998_v24 = vpop.f32.mrf.mxu1 }
 0x2e2   : > { %v1296_v27 = vadd.f32 %v1998_v24, %v1177_v23 }
 0x2e3   : > { %v1276_v29 = vpop.f32.mrf.mxu1 }
 0x2e4   : > { %v1307_v30 = vadd.f32 %v1940_v25, %v1296_v27  ;;  %v1295_v31 = vadd.f32 %v1276_v29, %v1172_v26 }
 0x2e6   : > { %1312 = vst.msk [vmem:[#allocation2 + $0x8] sm:$0xff] %vm1310_vm3, %v1307_v30  ;;  %v1306_v32 = vadd.f32 %v1940_v25, %v1295_v31  ;;  %v1639_v30 = vsel %vm1638_vm9, 1, %v2144_v14 }
 0x2e8   : > { %1311 = vst.msk [vmem:[#allocation2] sm:$0xff] %vm1310_vm3, %v1306_v32 }
 0x2ed   : > { %v1427_v1 = vld [vmem:[#allocation2 + $0x8] sm:$0xff] }
 0x2ef   : > { %v1318_v39 = vld [vmem:[#allocation2] sm:$0xff] }
 0x2fd   : > { %v2001_v34 = vpop.f32.mrf.mxu1 }
 0x2fe   : > { %v1298_v36 = vadd.f32 %v2001_v34, %v1187_v33 }
 0x2ff   : > { %v1286_v47 = vpop.f32.mrf.mxu1 }
 0x300   : > { %v1309_v37 = vadd.f32 %v1940_v25, %v1298_v36  ;;  %v1297_v38 = vadd.f32 %v1286_v47, %v1182_v35 }
 0x301   : > { %v1389_v40 = vpop.f32.mrf.mxu1 }
 0x302   : > { %1314 = vst.msk [vmem:[#allocation2 + $0x18] sm:$0xff] %vm1310_vm3, %v1309_v37  ;;  %v1308_v41 = vadd.f32 %v1940_v25, %v1297_v38  ;;  %v1393_v43 = vadd.f32 %v1389_v40, %v1318_v39 }
 0x303   : > { %v2008_v46 = vpop.f32.mrf.mxu1 }
 0x304   : > { %1313 = vst.msk [vmem:[#allocation2 + $0x10] sm:$0xff] %vm1310_vm3, %v1308_v41  ;;  %2071 = vtanh.f32 %v1393_v43  ;;  %v1941_v45 = vmul.f32 -1.442695, %v1393_v43 }
 0x306   : > { %2073 = vpow2.f32 %v1941_v45 }
 0x309   : > { %v1647_v46 = vld [vmem:[#allocation2 + $0x18] sm:$0xff] }
 0x30b   : > { %v1537_v24 = vld [vmem:[#allocation2 + $0x10] sm:$0xff] }
 0x311   : > { %v2072_v50 = vpop.eup %2071 }
 0x312   : > { %1403 = vrot.lane.b32.xlu1 %v2072_v50, %s2132_s16 }
 0x313   : > { %v2074_v52 = vpop.eup %2073 }
 0x314   : > { %v1397_v53 = vadd.f32 1.0, %v2074_v52 }
 0x316   : > { %1421 = vperm.xlu1 %2069, %v1419_v51   ;;  %2075 = vrcp.f32 %v1397_v53  ;;  %v1749_v53 = vsel %vm1748_vm11, 1, %v2144_v14 }
 0x323   : > { %v2076_v54 = vpop.eup %2075 }
 0x324   : > { %v1401_v63 = vmul.f32 0.0, %v2076_v54 }
 0x384   : > { %v1404_v60 = vpop.permute.xlu1 %1403 }
 0x385   : > { %v1406_v62 = vmul.f32 %v2076_v54, %v1404_v60 }
 0x387   : > { %1408 = vrot.lane.b32.xlu0 %v1406_v62, %s2145_s25 }
 0x391   : > { %v1422_v57 = vpop.permute.xlu1 %1421 }
 0x392   : > { %vm1423_vm5 = vcmp.eq.s32.totalorder %v1422_v57, 1 }
 0x3f9   : > { %v1409_v28 = vpop.permute.xlu0 %1408 }
 0x3fa   : > { %v1411_v55 = vadd.f32 %v1409_v28, %v1401_v63 }
 0x3fc   : > { %2077 = vtanh.f32 %v1411_v55  ;;  %v1425_v13 = vsel %vm1423_vm5, %v1411_v55, 0.0 }
 0x409   : > { %v2078_v56 = vpop.eup %2077 }
 0x40a   : > { %1414 = vrot.lane.b32.xlu0 %v2078_v56, %s2145_s25 }
 0x47c   : > { %v1415_v58 = vpop.permute.xlu0 %1414 }
 0x47d   : > { %v1417_v59 = vmul.f32 %v2076_v54, %v1415_v58 }
 0x47f   : > { %v1424_v61 = vsel %vm1423_vm5, %v1417_v59, 0.0 }
 0x480   : > { %1429 = vrot.lane.b32.xlu1 %v1424_v61, %s2137_s21 }
 0x4f2   : > { %v1430_v0 = vpop.permute.xlu1 %1429 }
 0x4f3   : > { %2014 = vmatmul.mubr.msk.f32.vlgmr.msra.gmra.mxu1 %vm1319_vm6, %v1430_v0 }
 0x4f4   : > { %2017 = vmatpush3.msra.mxu1 %v2511_v48  ;;  %2020 = vmatprep.mubr.msk.f32.mxu1 %vm2143_vm2, %v2131_v12 }
 0x4f5   : > { %2018 = vmatprep.subr.mxu1 %v2131_v12 }
 0x4f6   : > { %2019 = vmatpush3.msra.mxu1 %v2517_v10 }
 0x4f7   : > { %2023 = vmatprep.subr.mxu1 %v2131_v12 }
 0x5b3   : > { %v1499_v2 = vpop.f32.mrf.mxu1 }
 0x5b4   : > { %v1503_v3 = vadd.f32 %v1499_v2, %v1427_v1  ;;  %v1755_v2 = vld [vmem:[%s569_s20] sm:$0xff] }
 0x5b5   : > { %v2015_v4 = vpop.f32.mrf.mxu1 }
 0x5b6   : > { %2079 = vtanh.f32 %v1503_v3  ;;  %v1943_v6 = vmul.f32 -1.442695, %v1503_v3  ;;  %v1948_v4 = vld [vmem:[%s2635_s10] ss:$0 sm:$0xff] }
 0x5b8   : > { %2081 = vpow2.f32 %v1943_v6 }
 0x5c3   : > { %v2080_v42 = vpop.eup %2079 }
 0x5c4   : > { %1513 = vrot.lane.b32.xlu0 %v2080_v42, %s2132_s16 }
 0x5c5   : > { %v2082_v7 = vpop.eup %2081 }
 0x5c6   : > { %v1507_v8 = vadd.f32 1.0, %v2082_v7  ;;  %v1773_v7 = vstv %s1772_s28 }
 0x5c8   : > { %1531 = vperm.xlu0 %2070, %v1529_v5   ;;  %2083 = vrcp.f32 %v1507_v8 }
 0x5d5   : > { %v2084_v21 = vpop.eup %2083 }
 0x5d6   : > { %v1511_v15 = vmul.f32 %v2084_v21, %v1425_v13 }
 0x636   : > { %v1514_v9 = vpop.permute.xlu0 %1513 }
 0x637   : > { %v1516_v11 = vmul.f32 %v2084_v21, %v1514_v9 }
 0x639   : > { %1518 = vrot.lane.b32.xlu1 %v1516_v11, %s2145_s25 }
 0x643   : > { %v1532_v18 = vpop.permute.xlu0 %1531 }
 0x644   : > { %vm1533_vm8 = vcmp.eq.s32.totalorder %v1532_v18, 1 }
 0x6ab   : > { %v1519_v16 = vpop.permute.xlu1 %1518 }
 0x6ac   : > { %v1521_v44 = vadd.f32 %v1519_v16, %v1511_v15 }
 0x6ae   : > { %2085 = vtanh.f32 %v1521_v44  ;;  %v1535_v34 = vsel %vm1533_vm8, %v1521_v44, %v1425_v13  ;;  %v1775_v44 = vld [vmem:[%s573_s27] sm:$0xff] }
 0x6bb   : > { %v2086_v17 = vpop.eup %2085 }
 0x6bc   : > { %1524 = vrot.lane.b32.xlu1 %v2086_v17, %s2145_s25 }
 0x72e   : > { %v1525_v19 = vpop.permute.xlu1 %1524 }
 0x72f   : > { %v1527_v20 = vmul.f32 %v2084_v21, %v1525_v19 }
 0x731   : > { %v1534_v22 = vsel %vm1533_vm8, %v1527_v20, %v1424_v61 }
 0x732   : > { %1539 = vrot.lane.b32.xlu1 %v1534_v22, %s2137_s21 }
 0x7a4   : > { %v1540_v23 = vpop.permute.xlu1 %1539 }
 0x7a5   : > { %2021 = vmatmul.mubr.msk.f32.vlgmr.msra.gmra.mxu1 %vm1319_vm6, %v1540_v23 }
 0x7a6   : > { %2024 = vmatpush3.msra.mxu1 %v2511_v48  ;;  %2027 = vmatprep.mubr.msk.f32.mxu1 %vm2143_vm2, %v2131_v12 }
 0x7a7   : > { %2025 = vmatprep.subr.mxu1 %v2131_v12 }
 0x7a8   : > { %2026 = vmatpush3.msra.mxu1 %v2517_v10 }
 0x865   : > { %v1609_v25 = vpop.f32.mrf.mxu1 }
 0x866   : > { %v1613_v26 = vadd.f32 %v1609_v25, %v1537_v24 }
 0x867   : > { %v2022_v27 = vpop.f32.mrf.mxu1 }
 0x868   : > { %2087 = vtanh.f32 %v1613_v26  ;;  %v1945_v48 = vmul.f32 -1.442695, %v1613_v26 }
 0x86a   : > { %2089 = vpow2.f32 %v1945_v48 }
 0x875   : > { %v2088_v29 = vpop.eup %2087 }
 0x876   : > { %1623 = vrot.lane.b32.xlu0 %v2088_v29, %s2132_s16 }
 0x877   : > { %v2090_v31 = vpop.eup %2089 }
 0x878   : > { %v1617_v32 = vadd.f32 1.0, %v2090_v31 }
 0x87a   : > { %1641 = vperm.xlu0 %2070, %v1639_v30   ;;  %2091 = vrcp.f32 %v1617_v32 }
 0x887   : > { %v2092_v12 = vpop.eup %2091 }
 0x888   : > { %v1621_v35 = vmul.f32 %v2092_v12, %v1535_v34 }
 0x8e8   : > { %v1624_v10 = vpop.permute.xlu0 %1623 }
 0x8e9   : > { %v1626_v33 = vmul.f32 %v2092_v12, %v1624_v10 }
 0x8eb   : > { %1628 = vrot.lane.b32.xlu1 %v1626_v33, %s2145_s25 }
 0x8f5   : > { %v1642_v38 = vpop.permute.xlu0 %1641 }
 0x8f6   : > { %vm1643_vm10 = vcmp.eq.s32.totalorder %v1642_v38, 1 }
 0x95d   : > { %v1629_v36 = vpop.permute.xlu1 %1628 }
 0x95e   : > { %v1631_v47 = vadd.f32 %v1629_v36, %v1621_v35 }
 0x960   : > { %2093 = vtanh.f32 %v1631_v47  ;;  %v1645_v56 = vsel %vm1643_vm10, %v1631_v47, %v1535_v34 }
 0x96d   : > { %v2094_v37 = vpop.eup %2093 }
 0x96e   : > { %1634 = vrot.lane.b32.xlu1 %v2094_v37, %s2145_s25 }
 0x9e0   : > { %v1635_v39 = vpop.permute.xlu1 %1634 }
 0x9e1   : > { %v1637_v40 = vmul.f32 %v2092_v12, %v1635_v39 }
 0x9e3   : > { %v1644_v41 = vsel %vm1643_vm10, %v1637_v40, %v1534_v22 }
 0x9e4   : > { %1649 = vrot.lane.b32.xlu0 %v1644_v41, %s2137_s21 }
 0xa56   : > { %v1650_v43 = vpop.permute.xlu0 %1649 }
 0xa57   : > { %2028 = vmatmul.mubr.msk.f32.vlgmr.msra.gmra.mxu1 %vm1319_vm6, %v1650_v43 }
 0xb17   : > { %v1719_v50 = vpop.f32.mrf.mxu1 }
 0xb18   : > { %v1723_v51 = vadd.f32 %v1719_v50, %v1647_v46 }
 0xb19   : > { %v2029_v45 = vpop.f32.mrf.mxu1 }
 0xb1a   : > { %2095 = vtanh.f32 %v1723_v51  ;;  %v1947_v54 = vmul.f32 -1.442695, %v1723_v51 }
 0xb1c   : > { %2097 = vpow2.f32 %v1947_v54 }
 0xb27   : > { %v2096_v52 = vpop.eup %2095 }
 0xb28   : > { %1733 = vrot.lane.b32.xlu1 %v2096_v52, %s2132_s16 }
 0xb29   : > { %v2098_v60 = vpop.eup %2097 }
 0xb2a   : > { %v1727_v62 = vadd.f32 1.0, %v2098_v60 }
 0xb2c   : > { %1751 = vperm.xlu1 %2069, %v1749_v53   ;;  %2099 = vrcp.f32 %v1727_v62 }
 0xb39   : > { %v2100_v63 = vpop.eup %2099 }
 0xb3a   : > { %v1731_v49 = vmul.f32 %v2100_v63, %v1645_v56 }
 0xb9a   : > { %v1734_v28 = vpop.permute.xlu1 %1733 }
 0xb9b   : > { %v1736_v55 = vmul.f32 %v2100_v63, %v1734_v28 }
 0xb9d   : > { %1738 = vrot.lane.b32.xlu0 %v1736_v55, %s2145_s25 }
 0xba7   : > { %v1752_v14 = vpop.permute.xlu1 %1751 }
 0xba8   : > { %vm1753_vm12 = vcmp.eq.s32.totalorder %v1752_v14, 1 }
 0xc0f   : > { %v1739_v57 = vpop.permute.xlu0 %1738 }
 0xc10   : > { %v1741_v58 = vadd.f32 %v1739_v57, %v1731_v49 }
 0xc12   : > { %2101 = vtanh.f32 %v1741_v58 }
 0xc1f   : > { %v2102_v59 = vpop.eup %2101 }
 0xc20   : > { %1744 = vrot.lane.b32.xlu0 %v2102_v59, %s2145_s25 }
 0xc92   : > { %v1745_v61 = vpop.permute.xlu0 %1744 }
 0xc93   : > { %v1747_v0 = vmul.f32 %v2100_v63, %v1745_v61 }
 0xc95   : > { %v1754_v1 = vsel %vm1753_vm12, %v1747_v0, %v1644_v41 }
 0xc96   : > { %1757 = vrot.lane.b32.xlu1 %v1754_v1, %s2137_s21 }
 0xd08   : > { %v1758_v3 = vpop.permute.xlu1 %1757 }
 0xd09   : > { %v1760_v42 = vmul.f32 %v1758_v3, %v1755_v2 }
 0xd0b   : > { %v1768_v5 = vmul.f32 %v1948_v4, %v1760_v42 }
 0xd0d   : > { %v1769_v6 = vsel %vm1319_vm6, %v1768_v5, 0.0 }
 0xd0e   : > { %1770 = vadd.xlane.f32.xlu0 %v1769_v6 }
 0xd97   : > { %v1771_v8 = vpop.xlane.xlu0 %1770 }
 0xd98   : > { %v1774_v21 = vadd.f32 %v1773_v7, %v1771_v8 }
 0xd9a   : > { %v1779_v9 = vand.u32 2147483647, %v1774_v21  ;;  %v1776_v17 = vmax.f32 %v1774_v21, 0.0  ;;  %v1777_v18 = vmul.f32 %v1775_v44, %v1774_v21 }
 0xd9c   : > { %v1780_v11 = vsub.f32 0.0, %v1779_v9  ;;  %v1778_v20 = vsub.f32 %v1776_v17, %v1777_v18 }
 0xd9e   : > { %v1781_v13 = vmul.f32 1.442695, %v1780_v11 }
 0xda0   : > { %2103 = vpow2.f32 %v1781_v13 }
 0xdad   : > { %v2104_v15 = vpop.eup %2103 }
 0xdae   : > { %v1783_v16 = vadd.f32 1.0, %v2104_v15 }
 0xdb0   : > { %2105 = vlog2.f32 %v1783_v16 }
 0xdbd   : > { %v2106_v19 = vpop.eup %2105 }
 0xdbe   : > { %v1785_v22 = vmul.f32 0.6931472, %v2106_v19 }
 0xdc0   : > { %v1786_v23 = vadd.f32 %v1785_v22, %v1778_v20 }
 0xdc2   : > { %1788 = vst.msk [vmem:[%s577_s17] sm:$0xff] %vm1787_vm13, %v1786_v23 }
 0xdc3 PF: > { %p20_p9 = scmp.ge.s32.totalorder %s2231_s26, 4   ;;  %s2639_s23 = smov %s2125_s24 }
 0xdc4   : > { %s2640_s24 = smov %s2240_s29  ;;  %s2641_s25 = smov %s2231_s26 }
 0xdc5   :  { %22 = sbr.rel (!%p20_p9) target bundleno = 4 (0x4), region = 205 }

</bundles_post_ra>
